<compile_context>
chip_gen: v5e
topology: v5e:2x2
jax: 0.10.0
libtpu: 0.0.40
codegen_flags: <defaults>
</compile_context>

<pallas_src>
import math

import jax
import jax.numpy as jnp
from jax.experimental import pallas as pl
from jax.experimental.pallas import tpu as pltpu


# ---------------------------------------------------------------------------
# Fused NVL forward kernel
# ---------------------------------------------------------------------------
def nvl_kernel(x_ref, eps_ref,
               wihx_ref, e_b_ref, e_whh_ref,
               e_wmu_ref, e_bmu_ref, e_wlv_ref, e_blv_ref,
               d_wihz_ref, d_b_ref, d_whh_ref,
               we_head_ref, wd_head_ref, b_head_ref,
               out_ref):
    T, Bb, Din = x_ref.shape
    H = e_whh_ref.shape[0]
    G = 4 * H
    D = e_wmu_ref.shape[1]

    # ---- hoisted x-path projections for BOTH LSTMs (one fused matmul) ------
    x2d = x_ref[...].reshape(T * Bb, Din)
    xproj = jnp.dot(x2d, wihx_ref[...], preferred_element_type=jnp.float32)
    exw = (xproj[:, :G] + e_b_ref[...]).reshape(T, Bb, G)   # encoder, bias folded
    dxw = xproj[:, G:].reshape(T, Bb, G)                    # decoder x_{t-1} path
    eps3 = eps_ref[...]                                     # (T, Bb, D)

    e_whh = e_whh_ref[...]
    d_whh = d_whh_ref[...]
    d_wihz = d_wihz_ref[...]
    d_b = d_b_ref[...]
    e_wmu = e_wmu_ref[...]
    e_bmu = e_bmu_ref[...]
    e_wlv = e_wlv_ref[...]
    e_blv = e_blv_ref[...]

    def cell(gates, c):
        sig = jax.nn.sigmoid(gates[:, :3 * H])     # i, f, o with one sigmoid
        i_g = sig[:, 0 * H:1 * H]
        f_g = sig[:, 1 * H:2 * H]
        o_g = sig[:, 2 * H:3 * H]
        g_g = jnp.tanh(gates[:, 3 * H:])
        c_new = f_g * c + i_g * g_g
        h_new = o_g * jnp.tanh(c_new)
        return h_new, c_new

    def dec_step(s, z_s, h_d, c_d):
        # decoder input at step s is concat([x_{s-1}, z_s]); W_ih is split so
        # the shift+concat is just indexing the hoisted x projection at s-1.
        g_d = jnp.dot(z_s, d_wihz, preferred_element_type=jnp.float32) + d_b
        if s > 0:                                  # x_{-1} = 0, h_{-1} = 0
            g_d = g_d + dxw[s - 1]
            g_d = g_d + jnp.dot(h_d, d_whh, preferred_element_type=jnp.float32)
        return cell(g_d, c_d)

    zeros_bh = jnp.zeros((Bb, H), jnp.float32)
    h_e, c_e = zeros_bh, zeros_bh
    h_d, c_d = zeros_bh, zeros_bh
    z_prev = None
    h_e_steps, h_d_steps = [], []

    # static unroll (T is a small compile-time constant; switch the recurrence
    # to lax.fori_loop(..., unroll=2..4) if T grows beyond ~32).
    for t in range(T):
        # -------- encoder step t --------
        g_e = exw[t]
        if t > 0:                                  # h_e == 0 at t == 0
            g_e = g_e + jnp.dot(h_e, e_whh, preferred_element_type=jnp.float32)
        h_e, c_e = cell(g_e, c_e)
        h_e_steps.append(h_e)

        # z_t immediately (keeps the decoder only one step behind)
        mu_t = jnp.dot(h_e, e_wmu, preferred_element_type=jnp.float32) + e_bmu
        lv_t = jnp.dot(h_e, e_wlv, preferred_element_type=jnp.float32) + e_blv
        z_t = mu_t + jnp.exp(lv_t * 0.5) * eps3[t]

        # -------- decoder step t-1 (independent of encoder step t) --------
        if t > 0:
            h_d, c_d = dec_step(t - 1, z_prev, h_d, c_d)
            h_d_steps.append(h_d)
        z_prev = z_t

    # trailing decoder step T-1
    h_d, c_d = dec_step(T - 1, z_prev, h_d, c_d)
    h_d_steps.append(h_d)

    # ---- fused heads + single lane-contiguous output slab -------------------
    h_e_all = jnp.stack(h_e_steps, axis=0).reshape(T * Bb, H)
    h_d_all = jnp.stack(h_d_steps, axis=0).reshape(T * Bb, H)
    slab = (jnp.dot(h_e_all, we_head_ref[...], preferred_element_type=jnp.float32)
            + jnp.dot(h_d_all, wd_head_ref[...], preferred_element_type=jnp.float32)
            + b_head_ref[...])                     # (T*Bb, 4D) = [mu_e|lv_e|mu_d|lv_d]
    out_ref[...] = slab.reshape(T, Bb, 4 * D)      # one bulk store


# ---------------------------------------------------------------------------
# Wrapper: single pallas_call with a batch grid; splits/transposes outside.
# ---------------------------------------------------------------------------
def nvl_pallas(params, x, eps):
    B, T, x_dim = x.shape
    D = x_dim
    h_dim = params["e_whh"].shape[0]

    # batch tile: one program per batch block so v7x's 2 TCs can split work.
    if B <= 8:
        b_blk = B
    else:
        assert B % 8 == 0, "pad batch to a multiple of 8"
        b_blk = 8
    grid = (B // b_blk,)

    # time-major layout: per-step slices are contiguous; output is one slab.
    x_t = jnp.transpose(x, (1, 0, 2))              # (T, B, Din)
    eps_t = jnp.transpose(eps, (1, 0, 2))          # (T, B, D)

    # fused x-path projection weights (encoder | decoder-x) -> one matmul
    wihx_cat = jnp.concatenate([params["e_wih"], params["d_wihx"]], axis=1)
    # combined [mu_e | lv_e | mu_d | lv_d] head weights (block layout via 0 pads)
    zpad = jnp.zeros((h_dim, 2 * D), jnp.float32)
    we_head4 = jnp.concatenate([params["e_wmu"], params["e_wlv"], zpad], axis=1)
    wd_head4 = jnp.concatenate([zpad, params["d_wmu"], params["d_wlv"]], axis=1)
    b_head4 = jnp.concatenate([params["e_bmu"], params["e_blv"],
                               params["d_bmu"], params["d_blv"]], axis=1)

    weights = (wihx_cat, params["e_b"], params["e_whh"],
               params["e_wmu"], params["e_bmu"], params["e_wlv"], params["e_blv"],
               params["d_wihz"], params["d_b"], params["d_whh"],
               we_head4, wd_head4, b_head4)

    def batch_spec(shape):
        nd = len(shape)

        def imap(b):
            return (0, b) + (0,) * (nd - 2)

        return pl.BlockSpec((shape[0], b_blk) + tuple(shape[2:]), imap)

    def full_spec(arr):
        nd = arr.ndim

        def imap(b):
            return (0,) * nd

        return pl.BlockSpec(arr.shape, imap)

    in_specs = ([batch_spec(x_t.shape), batch_spec(eps_t.shape)]
                + [full_spec(w) for w in weights])
    out_spec = pl.BlockSpec((T, b_blk, 4 * D), lambda b: (0, b, 0))

    # explicit VMEM budget (review: re-derive for v7x's 64 MiB physical VMEM)
    operand_elems = (T * b_blk * (x_dim + D + 4 * D)
                     + sum(int(w.size) for w in weights))
    interm_elems = T * b_blk * (8 * h_dim + 4 * h_dim)
    vmem_limit = int(min(100 * 2**20,
                         max(8 * 2**20, 4 * 4 * (2 * operand_elems + interm_elems))))

    out = pl.pallas_call(
        nvl_kernel,
        grid=grid,
        out_shape=jax.ShapeDtypeStruct((T, B, 4 * D), jnp.float32),
        in_specs=in_specs,
        out_specs=out_spec,
        compiler_params=pltpu.CompilerParams(
            dimension_semantics=("parallel",),
            vmem_limit_bytes=vmem_limit),
    )(x_t, eps_t, *weights)

    out = jnp.transpose(out, (1, 0, 2))            # (B, T, 4D)
    return (out[..., :D], out[..., D:2 * D],
            out[..., 2 * D:3 * D], out[..., 3 * D:])


nvl_forward = jax.jit(nvl_pallas)


# ---------------------------------------------------------------------------
# Parameter construction (PyTorch-style uniform init, gate order [i, f, o, g])
# ---------------------------------------------------------------------------
def init_nvl_params(key, x_dim, h_dim):
    bound = 1.0 / math.sqrt(h_dim)

    def u(k, shape):
        return jax.random.uniform(k, shape, jnp.float32, -bound, bound)

    ks = jax.random.split(key, 17)
    p = {}
    # encoder LSTM (W^T layouts; gate column blocks are [i, f, o, g])
    p["e_wih"] = u(ks[0], (x_dim, 4 * h_dim))
    p["e_whh"] = u(ks[1], (h_dim, 4 * h_dim))
    p["e_b"] = u(ks[2], (1, 4 * h_dim)) + u(ks[3], (1, 4 * h_dim))  # b_ih + b_hh
    # encoder heads
    p["e_wmu"] = u(ks[4], (h_dim, x_dim)); p["e_bmu"] = u(ks[5], (1, x_dim))
    p["e_wlv"] = u(ks[6], (h_dim, x_dim)); p["e_blv"] = u(ks[7], (1, x_dim))
    # decoder LSTM; W_ih split into the x_previous block and the z block
    p["d_wihx"] = u(ks[8], (x_dim, 4 * h_dim))
    p["d_wihz"] = u(ks[9], (x_dim, 4 * h_dim))
    p["d_whh"] = u(ks[10], (h_dim, 4 * h_dim))
    p["d_b"] = u(ks[11], (1, 4 * h_dim)) + u(ks[12], (1, 4 * h_dim))
    # decoder heads
    p["d_wmu"] = u(ks[13], (h_dim, x_dim)); p["d_bmu"] = u(ks[14], (1, x_dim))
    p["d_wlv"] = u(ks[15], (h_dim, x_dim)); p["d_blv"] = u(ks[16], (1, x_dim))
    return p


# ---------------------------------------------------------------------------
# Pure-JAX reference (same math, used only for the correctness check in main)
# ---------------------------------------------------------------------------
def _ref_lstm(x, wih, whh, b, H):
    B, T, _ = x.shape
    h = jnp.zeros((B, H), jnp.float32)
    c = jnp.zeros((B, H), jnp.float32)
    hs = []
    for t in range(T):
        g = x[:, t] @ wih + h @ whh + b
        i = jax.nn.sigmoid(g[:, :H])
        f = jax.nn.sigmoid(g[:, H:2 * H])
        o = jax.nn.sigmoid(g[:, 2 * H:3 * H])
        gg = jnp.tanh(g[:, 3 * H:])
        c = f * c + i * gg
        h = o * jnp.tanh(c)
        hs.append(h)
    return jnp.stack(hs, axis=1)


def nvl_reference(params, x, eps):
    H = params["e_whh"].shape[0]
    h_e = _ref_lstm(x, params["e_wih"], params["e_whh"], params["e_b"], H)
    mu_e = h_e @ params["e_wmu"] + params["e_bmu"]
    lv_e = h_e @ params["e_wlv"] + params["e_blv"]
    z = mu_e + jnp.exp(lv_e * 0.5) * eps
    x_prev = jnp.concatenate([jnp.zeros_like(x[:, :1]), x[:, :-1]], axis=1)
    d_in = jnp.concatenate([x_prev, z], axis=2)
    d_wih = jnp.concatenate([params["d_wihx"], params["d_wihz"]], axis=0)
    h_d = _ref_lstm(d_in, d_wih, params["d_whh"], params["d_b"], H)
    mu_d = h_d @ params["d_wmu"] + params["d_bmu"]
    lv_d = h_d @ params["d_wlv"] + params["d_blv"]
    return mu_e, lv_e, mu_d, lv_d


# TODO(synk): loss_function / generate / save are outside forward() and are not
# implemented as kernels (generate is an autoregressive host-side loop).

if __name__ == "__main__":
    B, T = 2, 8
    X_DIM, H_DIM = 4, 32

    key = jax.random.PRNGKey(0)
    k_x, k_eps, k_p = jax.random.split(key, 3)
    x = jax.random.normal(k_x, (B, T, X_DIM), jnp.float32)
    eps = jax.random.normal(k_eps, (B, T, X_DIM), jnp.float32)  # randn_like(mu_e)
    params = init_nvl_params(k_p, X_DIM, H_DIM)

    mu_e, logvar_e, mu_d, logvar_d = nvl_forward(params, x, eps)
    jax.block_until_ready((mu_e, logvar_e, mu_d, logvar_d))

    assert mu_e.shape == (B, T, X_DIM) and logvar_e.shape == (B, T, X_DIM)
    assert mu_d.shape == (B, T, X_DIM) and logvar_d.shape == (B, T, X_DIM)

    # numerical check against the pure-JAX reference
    r_mu_e, r_lv_e, r_mu_d, r_lv_d = nvl_reference(params, x, eps)
    for got, ref in ((mu_e, r_mu_e), (logvar_e, r_lv_e),
                     (mu_d, r_mu_d), (logvar_d, r_lv_d)):
        err = float(jnp.max(jnp.abs(got - ref)))
        assert jnp.allclose(got, ref, rtol=1e-4, atol=1e-5), err

    print("KERNEL_OK")
</pallas_src>

<mosaic_0001>
module attributes {stable_mosaic.version = 11 : i64} {
  func.func @nvl_kernel(%arg0: i32, %arg1: memref<8x2x4xf32, #tpu.memory_space<vmem>>, %arg2: memref<8x2x4xf32, #tpu.memory_space<vmem>>, %arg3: memref<4x256xf32, #tpu.memory_space<vmem>>, %arg4: memref<1x128xf32, #tpu.memory_space<vmem>>, %arg5: memref<32x128xf32, #tpu.memory_space<vmem>>, %arg6: memref<32x4xf32, #tpu.memory_space<vmem>>, %arg7: memref<1x4xf32, #tpu.memory_space<vmem>>, %arg8: memref<32x4xf32, #tpu.memory_space<vmem>>, %arg9: memref<1x4xf32, #tpu.memory_space<vmem>>, %arg10: memref<4x128xf32, #tpu.memory_space<vmem>>, %arg11: memref<1x128xf32, #tpu.memory_space<vmem>>, %arg12: memref<32x128xf32, #tpu.memory_space<vmem>>, %arg13: memref<32x16xf32, #tpu.memory_space<vmem>>, %arg14: memref<32x16xf32, #tpu.memory_space<vmem>>, %arg15: memref<1x16xf32, #tpu.memory_space<vmem>>, %arg16: memref<8x2x16xf32, #tpu.memory_space<vmem>>) attributes {dimension_semantics = [#tpu.dimension_semantics<parallel>], iteration_bounds = array<i64: 1>, scalar_prefetch = 0 : i64, scratch_operands = 0 : i64, tpu.core_type = #tpu.core_type<tc>, window_params = [{transform_indices = @transform_0, window_bounds = array<i64: 8, 2, 4>}, {transform_indices = @transform_1, window_bounds = array<i64: 8, 2, 4>}, {pipeline_mode = #tpu.pipeline_mode<synchronous>, transform_indices = @transform_2, window_bounds = array<i64: 4, 256>}, {pipeline_mode = #tpu.pipeline_mode<synchronous>, transform_indices = @transform_3, window_bounds = array<i64: 1, 128>}, {pipeline_mode = #tpu.pipeline_mode<synchronous>, transform_indices = @transform_4, window_bounds = array<i64: 32, 128>}, {pipeline_mode = #tpu.pipeline_mode<synchronous>, transform_indices = @transform_5, window_bounds = array<i64: 32, 4>}, {pipeline_mode = #tpu.pipeline_mode<synchronous>, transform_indices = @transform_6, window_bounds = array<i64: 1, 4>}, {pipeline_mode = #tpu.pipeline_mode<synchronous>, transform_indices = @transform_7, window_bounds = array<i64: 32, 4>}, {pipeline_mode = #tpu.pipeline_mode<synchronous>, transform_indices = @transform_8, window_bounds = array<i64: 1, 4>}, {pipeline_mode = #tpu.pipeline_mode<synchronous>, transform_indices = @transform_9, window_bounds = array<i64: 4, 128>}, {pipeline_mode = #tpu.pipeline_mode<synchronous>, transform_indices = @transform_10, window_bounds = array<i64: 1, 128>}, {pipeline_mode = #tpu.pipeline_mode<synchronous>, transform_indices = @transform_11, window_bounds = array<i64: 32, 128>}, {pipeline_mode = #tpu.pipeline_mode<synchronous>, transform_indices = @transform_12, window_bounds = array<i64: 32, 16>}, {pipeline_mode = #tpu.pipeline_mode<synchronous>, transform_indices = @transform_13, window_bounds = array<i64: 32, 16>}, {pipeline_mode = #tpu.pipeline_mode<synchronous>, transform_indices = @transform_14, window_bounds = array<i64: 1, 16>}, {transform_indices = @transform_15, window_bounds = array<i64: 8, 2, 16>}]} {
    %c0 = arith.constant 0 : index
    %c0_0 = arith.constant 0 : index
    %c0_1 = arith.constant 0 : index
    %0 = vector.load %arg1[%c0, %c0_0, %c0_1] : memref<8x2x4xf32, #tpu.memory_space<vmem>>, vector<8x2x4xf32>
    %1 = vector.shape_cast %0 : vector<8x2x4xf32> to vector<16x4xf32>
    %c0_2 = arith.constant 0 : index
    %c0_3 = arith.constant 0 : index
    %2 = vector.load %arg3[%c0_2, %c0_3] : memref<4x256xf32, #tpu.memory_space<vmem>>, vector<4x256xf32>
    %cst = arith.constant dense<0.000000e+00> : vector<16x256xf32>
    %3 = tpu.matmul %1, %2, %cst {dimension_numbers = #tpu.dot_dimension_numbers<[1], [0], [0], [1], [0, 0, 1, 1], [], []>} : vector<16x4xf32>, vector<4x256xf32>, vector<16x256xf32> -> vector<16x256xf32>
    %4 = vector.extract_strided_slice %3 {offsets = [0, 0], sizes = [16, 128], strides = [1, 1]} : vector<16x256xf32> to vector<16x128xf32>
    %c0_4 = arith.constant 0 : index
    %c0_5 = arith.constant 0 : index
    %5 = vector.load %arg4[%c0_4, %c0_5] : memref<1x128xf32, #tpu.memory_space<vmem>>, vector<1x128xf32>
    %6 = vector.broadcast %5 : vector<1x128xf32> to vector<16x128xf32>
    %7 = arith.addf %4, %6 : vector<16x128xf32>
    %8 = vector.shape_cast %7 : vector<16x128xf32> to vector<8x2x128xf32>
    %9 = vector.extract_strided_slice %3 {offsets = [0, 128], sizes = [16, 128], strides = [1, 1]} : vector<16x256xf32> to vector<16x128xf32>
    %10 = vector.shape_cast %9 : vector<16x128xf32> to vector<8x2x128xf32>
    %c0_6 = arith.constant 0 : index
    %c0_7 = arith.constant 0 : index
    %c0_8 = arith.constant 0 : index
    %11 = vector.load %arg2[%c0_6, %c0_7, %c0_8] : memref<8x2x4xf32, #tpu.memory_space<vmem>>, vector<8x2x4xf32>
    %c0_9 = arith.constant 0 : index
    %c0_10 = arith.constant 0 : index
    %12 = vector.load %arg5[%c0_9, %c0_10] : memref<32x128xf32, #tpu.memory_space<vmem>>, vector<32x128xf32>
    %c0_11 = arith.constant 0 : index
    %c0_12 = arith.constant 0 : index
    %13 = vector.load %arg12[%c0_11, %c0_12] : memref<32x128xf32, #tpu.memory_space<vmem>>, vector<32x128xf32>
    %c0_13 = arith.constant 0 : index
    %c0_14 = arith.constant 0 : index
    %14 = vector.load %arg10[%c0_13, %c0_14] : memref<4x128xf32, #tpu.memory_space<vmem>>, vector<4x128xf32>
    %c0_15 = arith.constant 0 : index
    %c0_16 = arith.constant 0 : index
    %15 = vector.load %arg11[%c0_15, %c0_16] : memref<1x128xf32, #tpu.memory_space<vmem>>, vector<1x128xf32>
    %c0_17 = arith.constant 0 : index
    %c0_18 = arith.constant 0 : index
    %16 = vector.load %arg6[%c0_17, %c0_18] : memref<32x4xf32, #tpu.memory_space<vmem>>, vector<32x4xf32>
    %c0_19 = arith.constant 0 : index
    %c0_20 = arith.constant 0 : index
    %17 = vector.load %arg7[%c0_19, %c0_20] : memref<1x4xf32, #tpu.memory_space<vmem>>, vector<1x4xf32>
    %c0_21 = arith.constant 0 : index
    %c0_22 = arith.constant 0 : index
    %18 = vector.load %arg8[%c0_21, %c0_22] : memref<32x4xf32, #tpu.memory_space<vmem>>, vector<32x4xf32>
    %c0_23 = arith.constant 0 : index
    %c0_24 = arith.constant 0 : index
    %19 = vector.load %arg9[%c0_23, %c0_24] : memref<1x4xf32, #tpu.memory_space<vmem>>, vector<1x4xf32>
    %cst_25 = arith.constant 0.000000e+00 : f32
    %20 = vector.broadcast %cst_25 : f32 to vector<2x32xf32>
    %21 = vector.extract_strided_slice %8 {offsets = [0, 0, 0], sizes = [1, 2, 128], strides = [1, 1, 1]} : vector<8x2x128xf32> to vector<1x2x128xf32>
    %22 = vector.shape_cast %21 : vector<1x2x128xf32> to vector<2x128xf32>
    %23 = vector.extract_strided_slice %22 {offsets = [0, 0], sizes = [2, 96], strides = [1, 1]} : vector<2x128xf32> to vector<2x96xf32>
    %24 = arith.negf %23 : vector<2x96xf32>
    %25 = math.exp %24 : vector<2x96xf32>
    %cst_26 = arith.constant 1.000000e+00 : f32
    %26 = vector.broadcast %cst_26 : f32 to vector<2x96xf32>
    %27 = arith.addf %26, %25 : vector<2x96xf32>
    %28 = arith.divf %26, %27 : vector<2x96xf32>
    %29 = vector.extract_strided_slice %28 {offsets = [0, 0], sizes = [2, 32], strides = [1, 1]} : vector<2x96xf32> to vector<2x32xf32>
    %30 = vector.extract_strided_slice %28 {offsets = [0, 32], sizes = [2, 32], strides = [1, 1]} : vector<2x96xf32> to vector<2x32xf32>
    %31 = vector.extract_strided_slice %28 {offsets = [0, 64], sizes = [2, 32], strides = [1, 1]} : vector<2x96xf32> to vector<2x32xf32>
    %32 = vector.extract_strided_slice %22 {offsets = [0, 96], sizes = [2, 32], strides = [1, 1]} : vector<2x128xf32> to vector<2x32xf32>
    %33 = math.tanh %32 : vector<2x32xf32>
    %34 = arith.mulf %30, %20 : vector<2x32xf32>
    %35 = arith.mulf %29, %33 : vector<2x32xf32>
    %36 = arith.addf %34, %35 : vector<2x32xf32>
    %37 = math.tanh %36 : vector<2x32xf32>
    %38 = arith.mulf %31, %37 : vector<2x32xf32>
    %cst_27 = arith.constant dense<0.000000e+00> : vector<2x4xf32>
    %39 = tpu.matmul %38, %16, %cst_27 {dimension_numbers = #tpu.dot_dimension_numbers<[1], [0], [0], [1], [0, 0, 1, 1], [], []>} : vector<2x32xf32>, vector<32x4xf32>, vector<2x4xf32> -> vector<2x4xf32>
    %40 = vector.broadcast %17 : vector<1x4xf32> to vector<2x4xf32>
    %41 = arith.addf %39, %40 : vector<2x4xf32>
    %cst_28 = arith.constant dense<0.000000e+00> : vector<2x4xf32>
    %42 = tpu.matmul %38, %18, %cst_28 {dimension_numbers = #tpu.dot_dimension_numbers<[1], [0], [0], [1], [0, 0, 1, 1], [], []>} : vector<2x32xf32>, vector<32x4xf32>, vector<2x4xf32> -> vector<2x4xf32>
    %43 = vector.broadcast %19 : vector<1x4xf32> to vector<2x4xf32>
    %44 = arith.addf %42, %43 : vector<2x4xf32>
    %cst_29 = arith.constant 5.000000e-01 : f32
    %45 = vector.broadcast %cst_29 : f32 to vector<2x4xf32>
    %46 = arith.mulf %44, %45 : vector<2x4xf32>
    %47 = math.exp %46 : vector<2x4xf32>
    %48 = vector.extract_strided_slice %11 {offsets = [0, 0, 0], sizes = [1, 2, 4], strides = [1, 1, 1]} : vector<8x2x4xf32> to vector<1x2x4xf32>
    %49 = vector.shape_cast %48 : vector<1x2x4xf32> to vector<2x4xf32>
    %50 = arith.mulf %47, %49 : vector<2x4xf32>
    %51 = arith.addf %41, %50 : vector<2x4xf32>
    %52 = vector.extract_strided_slice %8 {offsets = [1, 0, 0], sizes = [1, 2, 128], strides = [1, 1, 1]} : vector<8x2x128xf32> to vector<1x2x128xf32>
    %53 = vector.shape_cast %52 : vector<1x2x128xf32> to vector<2x128xf32>
    %cst_30 = arith.constant dense<0.000000e+00> : vector<2x128xf32>
    %54 = tpu.matmul %38, %12, %cst_30 {dimension_numbers = #tpu.dot_dimension_numbers<[1], [0], [0], [1], [0, 0, 1, 1], [], []>} : vector<2x32xf32>, vector<32x128xf32>, vector<2x128xf32> -> vector<2x128xf32>
    %55 = arith.addf %53, %54 : vector<2x128xf32>
    %56 = vector.extract_strided_slice %55 {offsets = [0, 0], sizes = [2, 96], strides = [1, 1]} : vector<2x128xf32> to vector<2x96xf32>
    %57 = arith.negf %56 : vector<2x96xf32>
    %58 = math.exp %57 : vector<2x96xf32>
    %cst_31 = arith.constant 1.000000e+00 : f32
    %59 = vector.broadcast %cst_31 : f32 to vector<2x96xf32>
    %60 = arith.addf %59, %58 : vector<2x96xf32>
    %61 = arith.divf %59, %60 : vector<2x96xf32>
    %62 = vector.extract_strided_slice %61 {offsets = [0, 0], sizes = [2, 32], strides = [1, 1]} : vector<2x96xf32> to vector<2x32xf32>
    %63 = vector.extract_strided_slice %61 {offsets = [0, 32], sizes = [2, 32], strides = [1, 1]} : vector<2x96xf32> to vector<2x32xf32>
    %64 = vector.extract_strided_slice %61 {offsets = [0, 64], sizes = [2, 32], strides = [1, 1]} : vector<2x96xf32> to vector<2x32xf32>
    %65 = vector.extract_strided_slice %55 {offsets = [0, 96], sizes = [2, 32], strides = [1, 1]} : vector<2x128xf32> to vector<2x32xf32>
    %66 = math.tanh %65 : vector<2x32xf32>
    %67 = arith.mulf %63, %36 : vector<2x32xf32>
    %68 = arith.mulf %62, %66 : vector<2x32xf32>
    %69 = arith.addf %67, %68 : vector<2x32xf32>
    %70 = math.tanh %69 : vector<2x32xf32>
    %71 = arith.mulf %64, %70 : vector<2x32xf32>
    %cst_32 = arith.constant dense<0.000000e+00> : vector<2x4xf32>
    %72 = tpu.matmul %71, %16, %cst_32 {dimension_numbers = #tpu.dot_dimension_numbers<[1], [0], [0], [1], [0, 0, 1, 1], [], []>} : vector<2x32xf32>, vector<32x4xf32>, vector<2x4xf32> -> vector<2x4xf32>
    %73 = vector.broadcast %17 : vector<1x4xf32> to vector<2x4xf32>
    %74 = arith.addf %72, %73 : vector<2x4xf32>
    %cst_33 = arith.constant dense<0.000000e+00> : vector<2x4xf32>
    %75 = tpu.matmul %71, %18, %cst_33 {dimension_numbers = #tpu.dot_dimension_numbers<[1], [0], [0], [1], [0, 0, 1, 1], [], []>} : vector<2x32xf32>, vector<32x4xf32>, vector<2x4xf32> -> vector<2x4xf32>
    %76 = vector.broadcast %19 : vector<1x4xf32> to vector<2x4xf32>
    %77 = arith.addf %75, %76 : vector<2x4xf32>
    %cst_34 = arith.constant 5.000000e-01 : f32
    %78 = vector.broadcast %cst_34 : f32 to vector<2x4xf32>
    %79 = arith.mulf %77, %78 : vector<2x4xf32>
    %80 = math.exp %79 : vector<2x4xf32>
    %81 = vector.extract_strided_slice %11 {offsets = [1, 0, 0], sizes = [1, 2, 4], strides = [1, 1, 1]} : vector<8x2x4xf32> to vector<1x2x4xf32>
    %82 = vector.shape_cast %81 : vector<1x2x4xf32> to vector<2x4xf32>
    %83 = arith.mulf %80, %82 : vector<2x4xf32>
    %84 = arith.addf %74, %83 : vector<2x4xf32>
    %cst_35 = arith.constant dense<0.000000e+00> : vector<2x128xf32>
    %85 = tpu.matmul %51, %14, %cst_35 {dimension_numbers = #tpu.dot_dimension_numbers<[1], [0], [0], [1], [0, 0, 1, 1], [], []>} : vector<2x4xf32>, vector<4x128xf32>, vector<2x128xf32> -> vector<2x128xf32>
    %86 = vector.broadcast %15 : vector<1x128xf32> to vector<2x128xf32>
    %87 = arith.addf %85, %86 : vector<2x128xf32>
    %88 = vector.extract_strided_slice %87 {offsets = [0, 0], sizes = [2, 96], strides = [1, 1]} : vector<2x128xf32> to vector<2x96xf32>
    %89 = arith.negf %88 : vector<2x96xf32>
    %90 = math.exp %89 : vector<2x96xf32>
    %cst_36 = arith.constant 1.000000e+00 : f32
    %91 = vector.broadcast %cst_36 : f32 to vector<2x96xf32>
    %92 = arith.addf %91, %90 : vector<2x96xf32>
    %93 = arith.divf %91, %92 : vector<2x96xf32>
    %94 = vector.extract_strided_slice %93 {offsets = [0, 0], sizes = [2, 32], strides = [1, 1]} : vector<2x96xf32> to vector<2x32xf32>
    %95 = vector.extract_strided_slice %93 {offsets = [0, 32], sizes = [2, 32], strides = [1, 1]} : vector<2x96xf32> to vector<2x32xf32>
    %96 = vector.extract_strided_slice %93 {offsets = [0, 64], sizes = [2, 32], strides = [1, 1]} : vector<2x96xf32> to vector<2x32xf32>
    %97 = vector.extract_strided_slice %87 {offsets = [0, 96], sizes = [2, 32], strides = [1, 1]} : vector<2x128xf32> to vector<2x32xf32>
    %98 = math.tanh %97 : vector<2x32xf32>
    %99 = arith.mulf %95, %20 : vector<2x32xf32>
    %100 = arith.mulf %94, %98 : vector<2x32xf32>
    %101 = arith.addf %99, %100 : vector<2x32xf32>
    %102 = math.tanh %101 : vector<2x32xf32>
    %103 = arith.mulf %96, %102 : vector<2x32xf32>
    %104 = vector.extract_strided_slice %8 {offsets = [2, 0, 0], sizes = [1, 2, 128], strides = [1, 1, 1]} : vector<8x2x128xf32> to vector<1x2x128xf32>
    %105 = vector.shape_cast %104 : vector<1x2x128xf32> to vector<2x128xf32>
    %cst_37 = arith.constant dense<0.000000e+00> : vector<2x128xf32>
    %106 = tpu.matmul %71, %12, %cst_37 {dimension_numbers = #tpu.dot_dimension_numbers<[1], [0], [0], [1], [0, 0, 1, 1], [], []>} : vector<2x32xf32>, vector<32x128xf32>, vector<2x128xf32> -> vector<2x128xf32>
    %107 = arith.addf %105, %106 : vector<2x128xf32>
    %108 = vector.extract_strided_slice %107 {offsets = [0, 0], sizes = [2, 96], strides = [1, 1]} : vector<2x128xf32> to vector<2x96xf32>
    %109 = arith.negf %108 : vector<2x96xf32>
    %110 = math.exp %109 : vector<2x96xf32>
    %cst_38 = arith.constant 1.000000e+00 : f32
    %111 = vector.broadcast %cst_38 : f32 to vector<2x96xf32>
    %112 = arith.addf %111, %110 : vector<2x96xf32>
    %113 = arith.divf %111, %112 : vector<2x96xf32>
    %114 = vector.extract_strided_slice %113 {offsets = [0, 0], sizes = [2, 32], strides = [1, 1]} : vector<2x96xf32> to vector<2x32xf32>
    %115 = vector.extract_strided_slice %113 {offsets = [0, 32], sizes = [2, 32], strides = [1, 1]} : vector<2x96xf32> to vector<2x32xf32>
    %116 = vector.extract_strided_slice %113 {offsets = [0, 64], sizes = [2, 32], strides = [1, 1]} : vector<2x96xf32> to vector<2x32xf32>
    %117 = vector.extract_strided_slice %107 {offsets = [0, 96], sizes = [2, 32], strides = [1, 1]} : vector<2x128xf32> to vector<2x32xf32>
    %118 = math.tanh %117 : vector<2x32xf32>
    %119 = arith.mulf %115, %69 : vector<2x32xf32>
    %120 = arith.mulf %114, %118 : vector<2x32xf32>
    %121 = arith.addf %119, %120 : vector<2x32xf32>
    %122 = math.tanh %121 : vector<2x32xf32>
    %123 = arith.mulf %116, %122 : vector<2x32xf32>
    %cst_39 = arith.constant dense<0.000000e+00> : vector<2x4xf32>
    %124 = tpu.matmul %123, %16, %cst_39 {dimension_numbers = #tpu.dot_dimension_numbers<[1], [0], [0], [1], [0, 0, 1, 1], [], []>} : vector<2x32xf32>, vector<32x4xf32>, vector<2x4xf32> -> vector<2x4xf32>
    %125 = vector.broadcast %17 : vector<1x4xf32> to vector<2x4xf32>
    %126 = arith.addf %124, %125 : vector<2x4xf32>
    %cst_40 = arith.constant dense<0.000000e+00> : vector<2x4xf32>
    %127 = tpu.matmul %123, %18, %cst_40 {dimension_numbers = #tpu.dot_dimension_numbers<[1], [0], [0], [1], [0, 0, 1, 1], [], []>} : vector<2x32xf32>, vector<32x4xf32>, vector<2x4xf32> -> vector<2x4xf32>
    %128 = vector.broadcast %19 : vector<1x4xf32> to vector<2x4xf32>
    %129 = arith.addf %127, %128 : vector<2x4xf32>
    %cst_41 = arith.constant 5.000000e-01 : f32
    %130 = vector.broadcast %cst_41 : f32 to vector<2x4xf32>
    %131 = arith.mulf %129, %130 : vector<2x4xf32>
    %132 = math.exp %131 : vector<2x4xf32>
    %133 = vector.extract_strided_slice %11 {offsets = [2, 0, 0], sizes = [1, 2, 4], strides = [1, 1, 1]} : vector<8x2x4xf32> to vector<1x2x4xf32>
    %134 = vector.shape_cast %133 : vector<1x2x4xf32> to vector<2x4xf32>
    %135 = arith.mulf %132, %134 : vector<2x4xf32>
    %136 = arith.addf %126, %135 : vector<2x4xf32>
    %cst_42 = arith.constant dense<0.000000e+00> : vector<2x128xf32>
    %137 = tpu.matmul %84, %14, %cst_42 {dimension_numbers = #tpu.dot_dimension_numbers<[1], [0], [0], [1], [0, 0, 1, 1], [], []>} : vector<2x4xf32>, vector<4x128xf32>, vector<2x128xf32> -> vector<2x128xf32>
    %138 = vector.broadcast %15 : vector<1x128xf32> to vector<2x128xf32>
    %139 = arith.addf %137, %138 : vector<2x128xf32>
    %140 = vector.extract_strided_slice %10 {offsets = [0, 0, 0], sizes = [1, 2, 128], strides = [1, 1, 1]} : vector<8x2x128xf32> to vector<1x2x128xf32>
    %141 = vector.shape_cast %140 : vector<1x2x128xf32> to vector<2x128xf32>
    %142 = arith.addf %139, %141 : vector<2x128xf32>
    %cst_43 = arith.constant dense<0.000000e+00> : vector<2x128xf32>
    %143 = tpu.matmul %103, %13, %cst_43 {dimension_numbers = #tpu.dot_dimension_numbers<[1], [0], [0], [1], [0, 0, 1, 1], [], []>} : vector<2x32xf32>, vector<32x128xf32>, vector<2x128xf32> -> vector<2x128xf32>
    %144 = arith.addf %142, %143 : vector<2x128xf32>
    %145 = vector.extract_strided_slice %144 {offsets = [0, 0], sizes = [2, 96], strides = [1, 1]} : vector<2x128xf32> to vector<2x96xf32>
    %146 = arith.negf %145 : vector<2x96xf32>
    %147 = math.exp %146 : vector<2x96xf32>
    %cst_44 = arith.constant 1.000000e+00 : f32
    %148 = vector.broadcast %cst_44 : f32 to vector<2x96xf32>
    %149 = arith.addf %148, %147 : vector<2x96xf32>
    %150 = arith.divf %148, %149 : vector<2x96xf32>
    %151 = vector.extract_strided_slice %150 {offsets = [0, 0], sizes = [2, 32], strides = [1, 1]} : vector<2x96xf32> to vector<2x32xf32>
    %152 = vector.extract_strided_slice %150 {offsets = [0, 32], sizes = [2, 32], strides = [1, 1]} : vector<2x96xf32> to vector<2x32xf32>
    %153 = vector.extract_strided_slice %150 {offsets = [0, 64], sizes = [2, 32], strides = [1, 1]} : vector<2x96xf32> to vector<2x32xf32>
    %154 = vector.extract_strided_slice %144 {offsets = [0, 96], sizes = [2, 32], strides = [1, 1]} : vector<2x128xf32> to vector<2x32xf32>
    %155 = math.tanh %154 : vector<2x32xf32>
    %156 = arith.mulf %152, %101 : vector<2x32xf32>
    %157 = arith.mulf %151, %155 : vector<2x32xf32>
    %158 = arith.addf %156, %157 : vector<2x32xf32>
    %159 = math.tanh %158 : vector<2x32xf32>
    %160 = arith.mulf %153, %159 : vector<2x32xf32>
    %161 = vector.extract_strided_slice %8 {offsets = [3, 0, 0], sizes = [1, 2, 128], strides = [1, 1, 1]} : vector<8x2x128xf32> to vector<1x2x128xf32>
    %162 = vector.shape_cast %161 : vector<1x2x128xf32> to vector<2x128xf32>
    %cst_45 = arith.constant dense<0.000000e+00> : vector<2x128xf32>
    %163 = tpu.matmul %123, %12, %cst_45 {dimension_numbers = #tpu.dot_dimension_numbers<[1], [0], [0], [1], [0, 0, 1, 1], [], []>} : vector<2x32xf32>, vector<32x128xf32>, vector<2x128xf32> -> vector<2x128xf32>
    %164 = arith.addf %162, %163 : vector<2x128xf32>
    %165 = vector.extract_strided_slice %164 {offsets = [0, 0], sizes = [2, 96], strides = [1, 1]} : vector<2x128xf32> to vector<2x96xf32>
    %166 = arith.negf %165 : vector<2x96xf32>
    %167 = math.exp %166 : vector<2x96xf32>
    %cst_46 = arith.constant 1.000000e+00 : f32
    %168 = vector.broadcast %cst_46 : f32 to vector<2x96xf32>
    %169 = arith.addf %168, %167 : vector<2x96xf32>
    %170 = arith.divf %168, %169 : vector<2x96xf32>
    %171 = vector.extract_strided_slice %170 {offsets = [0, 0], sizes = [2, 32], strides = [1, 1]} : vector<2x96xf32> to vector<2x32xf32>
    %172 = vector.extract_strided_slice %170 {offsets = [0, 32], sizes = [2, 32], strides = [1, 1]} : vector<2x96xf32> to vector<2x32xf32>
    %173 = vector.extract_strided_slice %170 {offsets = [0, 64], sizes = [2, 32], strides = [1, 1]} : vector<2x96xf32> to vector<2x32xf32>
    %174 = vector.extract_strided_slice %164 {offsets = [0, 96], sizes = [2, 32], strides = [1, 1]} : vector<2x128xf32> to vector<2x32xf32>
    %175 = math.tanh %174 : vector<2x32xf32>
    %176 = arith.mulf %172, %121 : vector<2x32xf32>
    %177 = arith.mulf %171, %175 : vector<2x32xf32>
    %178 = arith.addf %176, %177 : vector<2x32xf32>
    %179 = math.tanh %178 : vector<2x32xf32>
    %180 = arith.mulf %173, %179 : vector<2x32xf32>
    %cst_47 = arith.constant dense<0.000000e+00> : vector<2x4xf32>
    %181 = tpu.matmul %180, %16, %cst_47 {dimension_numbers = #tpu.dot_dimension_numbers<[1], [0], [0], [1], [0, 0, 1, 1], [], []>} : vector<2x32xf32>, vector<32x4xf32>, vector<2x4xf32> -> vector<2x4xf32>
    %182 = vector.broadcast %17 : vector<1x4xf32> to vector<2x4xf32>
    %183 = arith.addf %181, %182 : vector<2x4xf32>
    %cst_48 = arith.constant dense<0.000000e+00> : vector<2x4xf32>
    %184 = tpu.matmul %180, %18, %cst_48 {dimension_numbers = #tpu.dot_dimension_numbers<[1], [0], [0], [1], [0, 0, 1, 1], [], []>} : vector<2x32xf32>, vector<32x4xf32>, vector<2x4xf32> -> vector<2x4xf32>
    %185 = vector.broadcast %19 : vector<1x4xf32> to vector<2x4xf32>
    %186 = arith.addf %184, %185 : vector<2x4xf32>
    %cst_49 = arith.constant 5.000000e-01 : f32
    %187 = vector.broadcast %cst_49 : f32 to vector<2x4xf32>
    %188 = arith.mulf %186, %187 : vector<2x4xf32>
    %189 = math.exp %188 : vector<2x4xf32>
    %190 = vector.extract_strided_slice %11 {offsets = [3, 0, 0], sizes = [1, 2, 4], strides = [1, 1, 1]} : vector<8x2x4xf32> to vector<1x2x4xf32>
    %191 = vector.shape_cast %190 : vector<1x2x4xf32> to vector<2x4xf32>
    %192 = arith.mulf %189, %191 : vector<2x4xf32>
    %193 = arith.addf %183, %192 : vector<2x4xf32>
    %cst_50 = arith.constant dense<0.000000e+00> : vector<2x128xf32>
    %194 = tpu.matmul %136, %14, %cst_50 {dimension_numbers = #tpu.dot_dimension_numbers<[1], [0], [0], [1], [0, 0, 1, 1], [], []>} : vector<2x4xf32>, vector<4x128xf32>, vector<2x128xf32> -> vector<2x128xf32>
    %195 = vector.broadcast %15 : vector<1x128xf32> to vector<2x128xf32>
    %196 = arith.addf %194, %195 : vector<2x128xf32>
    %197 = vector.extract_strided_slice %10 {offsets = [1, 0, 0], sizes = [1, 2, 128], strides = [1, 1, 1]} : vector<8x2x128xf32> to vector<1x2x128xf32>
    %198 = vector.shape_cast %197 : vector<1x2x128xf32> to vector<2x128xf32>
    %199 = arith.addf %196, %198 : vector<2x128xf32>
    %cst_51 = arith.constant dense<0.000000e+00> : vector<2x128xf32>
    %200 = tpu.matmul %160, %13, %cst_51 {dimension_numbers = #tpu.dot_dimension_numbers<[1], [0], [0], [1], [0, 0, 1, 1], [], []>} : vector<2x32xf32>, vector<32x128xf32>, vector<2x128xf32> -> vector<2x128xf32>
    %201 = arith.addf %199, %200 : vector<2x128xf32>
    %202 = vector.extract_strided_slice %201 {offsets = [0, 0], sizes = [2, 96], strides = [1, 1]} : vector<2x128xf32> to vector<2x96xf32>
    %203 = arith.negf %202 : vector<2x96xf32>
    %204 = math.exp %203 : vector<2x96xf32>
    %cst_52 = arith.constant 1.000000e+00 : f32
    %205 = vector.broadcast %cst_52 : f32 to vector<2x96xf32>
    %206 = arith.addf %205, %204 : vector<2x96xf32>
    %207 = arith.divf %205, %206 : vector<2x96xf32>
    %208 = vector.extract_strided_slice %207 {offsets = [0, 0], sizes = [2, 32], strides = [1, 1]} : vector<2x96xf32> to vector<2x32xf32>
    %209 = vector.extract_strided_slice %207 {offsets = [0, 32], sizes = [2, 32], strides = [1, 1]} : vector<2x96xf32> to vector<2x32xf32>
    %210 = vector.extract_strided_slice %207 {offsets = [0, 64], sizes = [2, 32], strides = [1, 1]} : vector<2x96xf32> to vector<2x32xf32>
    %211 = vector.extract_strided_slice %201 {offsets = [0, 96], sizes = [2, 32], strides = [1, 1]} : vector<2x128xf32> to vector<2x32xf32>
    %212 = math.tanh %211 : vector<2x32xf32>
    %213 = arith.mulf %209, %158 : vector<2x32xf32>
    %214 = arith.mulf %208, %212 : vector<2x32xf32>
    %215 = arith.addf %213, %214 : vector<2x32xf32>
    %216 = math.tanh %215 : vector<2x32xf32>
    %217 = arith.mulf %210, %216 : vector<2x32xf32>
    %218 = vector.extract_strided_slice %8 {offsets = [4, 0, 0], sizes = [1, 2, 128], strides = [1, 1, 1]} : vector<8x2x128xf32> to vector<1x2x128xf32>
    %219 = vector.shape_cast %218 : vector<1x2x128xf32> to vector<2x128xf32>
    %cst_53 = arith.constant dense<0.000000e+00> : vector<2x128xf32>
    %220 = tpu.matmul %180, %12, %cst_53 {dimension_numbers = #tpu.dot_dimension_numbers<[1], [0], [0], [1], [0, 0, 1, 1], [], []>} : vector<2x32xf32>, vector<32x128xf32>, vector<2x128xf32> -> vector<2x128xf32>
    %221 = arith.addf %219, %220 : vector<2x128xf32>
    %222 = vector.extract_strided_slice %221 {offsets = [0, 0], sizes = [2, 96], strides = [1, 1]} : vector<2x128xf32> to vector<2x96xf32>
    %223 = arith.negf %222 : vector<2x96xf32>
    %224 = math.exp %223 : vector<2x96xf32>
    %cst_54 = arith.constant 1.000000e+00 : f32
    %225 = vector.broadcast %cst_54 : f32 to vector<2x96xf32>
    %226 = arith.addf %225, %224 : vector<2x96xf32>
    %227 = arith.divf %225, %226 : vector<2x96xf32>
    %228 = vector.extract_strided_slice %227 {offsets = [0, 0], sizes = [2, 32], strides = [1, 1]} : vector<2x96xf32> to vector<2x32xf32>
    %229 = vector.extract_strided_slice %227 {offsets = [0, 32], sizes = [2, 32], strides = [1, 1]} : vector<2x96xf32> to vector<2x32xf32>
    %230 = vector.extract_strided_slice %227 {offsets = [0, 64], sizes = [2, 32], strides = [1, 1]} : vector<2x96xf32> to vector<2x32xf32>
    %231 = vector.extract_strided_slice %221 {offsets = [0, 96], sizes = [2, 32], strides = [1, 1]} : vector<2x128xf32> to vector<2x32xf32>
    %232 = math.tanh %231 : vector<2x32xf32>
    %233 = arith.mulf %229, %178 : vector<2x32xf32>
    %234 = arith.mulf %228, %232 : vector<2x32xf32>
    %235 = arith.addf %233, %234 : vector<2x32xf32>
    %236 = math.tanh %235 : vector<2x32xf32>
    %237 = arith.mulf %230, %236 : vector<2x32xf32>
    %cst_55 = arith.constant dense<0.000000e+00> : vector<2x4xf32>
    %238 = tpu.matmul %237, %16, %cst_55 {dimension_numbers = #tpu.dot_dimension_numbers<[1], [0], [0], [1], [0, 0, 1, 1], [], []>} : vector<2x32xf32>, vector<32x4xf32>, vector<2x4xf32> -> vector<2x4xf32>
    %239 = vector.broadcast %17 : vector<1x4xf32> to vector<2x4xf32>
    %240 = arith.addf %238, %239 : vector<2x4xf32>
    %cst_56 = arith.constant dense<0.000000e+00> : vector<2x4xf32>
    %241 = tpu.matmul %237, %18, %cst_56 {dimension_numbers = #tpu.dot_dimension_numbers<[1], [0], [0], [1], [0, 0, 1, 1], [], []>} : vector<2x32xf32>, vector<32x4xf32>, vector<2x4xf32> -> vector<2x4xf32>
    %242 = vector.broadcast %19 : vector<1x4xf32> to vector<2x4xf32>
    %243 = arith.addf %241, %242 : vector<2x4xf32>
    %cst_57 = arith.constant 5.000000e-01 : f32
    %244 = vector.broadcast %cst_57 : f32 to vector<2x4xf32>
    %245 = arith.mulf %243, %244 : vector<2x4xf32>
    %246 = math.exp %245 : vector<2x4xf32>
    %247 = vector.extract_strided_slice %11 {offsets = [4, 0, 0], sizes = [1, 2, 4], strides = [1, 1, 1]} : vector<8x2x4xf32> to vector<1x2x4xf32>
    %248 = vector.shape_cast %247 : vector<1x2x4xf32> to vector<2x4xf32>
    %249 = arith.mulf %246, %248 : vector<2x4xf32>
    %250 = arith.addf %240, %249 : vector<2x4xf32>
    %cst_58 = arith.constant dense<0.000000e+00> : vector<2x128xf32>
    %251 = tpu.matmul %193, %14, %cst_58 {dimension_numbers = #tpu.dot_dimension_numbers<[1], [0], [0], [1], [0, 0, 1, 1], [], []>} : vector<2x4xf32>, vector<4x128xf32>, vector<2x128xf32> -> vector<2x128xf32>
    %252 = vector.broadcast %15 : vector<1x128xf32> to vector<2x128xf32>
    %253 = arith.addf %251, %252 : vector<2x128xf32>
    %254 = vector.extract_strided_slice %10 {offsets = [2, 0, 0], sizes = [1, 2, 128], strides = [1, 1, 1]} : vector<8x2x128xf32> to vector<1x2x128xf32>
    %255 = vector.shape_cast %254 : vector<1x2x128xf32> to vector<2x128xf32>
    %256 = arith.addf %253, %255 : vector<2x128xf32>
    %cst_59 = arith.constant dense<0.000000e+00> : vector<2x128xf32>
    %257 = tpu.matmul %217, %13, %cst_59 {dimension_numbers = #tpu.dot_dimension_numbers<[1], [0], [0], [1], [0, 0, 1, 1], [], []>} : vector<2x32xf32>, vector<32x128xf32>, vector<2x128xf32> -> vector<2x128xf32>
    %258 = arith.addf %256, %257 : vector<2x128xf32>
    %259 = vector.extract_strided_slice %258 {offsets = [0, 0], sizes = [2, 96], strides = [1, 1]} : vector<2x128xf32> to vector<2x96xf32>
    %260 = arith.negf %259 : vector<2x96xf32>
    %261 = math.exp %260 : vector<2x96xf32>
    %cst_60 = arith.constant 1.000000e+00 : f32
    %262 = vector.broadcast %cst_60 : f32 to vector<2x96xf32>
    %263 = arith.addf %262, %261 : vector<2x96xf32>
    %264 = arith.divf %262, %263 : vector<2x96xf32>
    %265 = vector.extract_strided_slice %264 {offsets = [0, 0], sizes = [2, 32], strides = [1, 1]} : vector<2x96xf32> to vector<2x32xf32>
    %266 = vector.extract_strided_slice %264 {offsets = [0, 32], sizes = [2, 32], strides = [1, 1]} : vector<2x96xf32> to vector<2x32xf32>
    %267 = vector.extract_strided_slice %264 {offsets = [0, 64], sizes = [2, 32], strides = [1, 1]} : vector<2x96xf32> to vector<2x32xf32>
    %268 = vector.extract_strided_slice %258 {offsets = [0, 96], sizes = [2, 32], strides = [1, 1]} : vector<2x128xf32> to vector<2x32xf32>
    %269 = math.tanh %268 : vector<2x32xf32>
    %270 = arith.mulf %266, %215 : vector<2x32xf32>
    %271 = arith.mulf %265, %269 : vector<2x32xf32>
    %272 = arith.addf %270, %271 : vector<2x32xf32>
    %273 = math.tanh %272 : vector<2x32xf32>
    %274 = arith.mulf %267, %273 : vector<2x32xf32>
    %275 = vector.extract_strided_slice %8 {offsets = [5, 0, 0], sizes = [1, 2, 128], strides = [1, 1, 1]} : vector<8x2x128xf32> to vector<1x2x128xf32>
    %276 = vector.shape_cast %275 : vector<1x2x128xf32> to vector<2x128xf32>
    %cst_61 = arith.constant dense<0.000000e+00> : vector<2x128xf32>
    %277 = tpu.matmul %237, %12, %cst_61 {dimension_numbers = #tpu.dot_dimension_numbers<[1], [0], [0], [1], [0, 0, 1, 1], [], []>} : vector<2x32xf32>, vector<32x128xf32>, vector<2x128xf32> -> vector<2x128xf32>
    %278 = arith.addf %276, %277 : vector<2x128xf32>
    %279 = vector.extract_strided_slice %278 {offsets = [0, 0], sizes = [2, 96], strides = [1, 1]} : vector<2x128xf32> to vector<2x96xf32>
    %280 = arith.negf %279 : vector<2x96xf32>
    %281 = math.exp %280 : vector<2x96xf32>
    %cst_62 = arith.constant 1.000000e+00 : f32
    %282 = vector.broadcast %cst_62 : f32 to vector<2x96xf32>
    %283 = arith.addf %282, %281 : vector<2x96xf32>
    %284 = arith.divf %282, %283 : vector<2x96xf32>
    %285 = vector.extract_strided_slice %284 {offsets = [0, 0], sizes = [2, 32], strides = [1, 1]} : vector<2x96xf32> to vector<2x32xf32>
    %286 = vector.extract_strided_slice %284 {offsets = [0, 32], sizes = [2, 32], strides = [1, 1]} : vector<2x96xf32> to vector<2x32xf32>
    %287 = vector.extract_strided_slice %284 {offsets = [0, 64], sizes = [2, 32], strides = [1, 1]} : vector<2x96xf32> to vector<2x32xf32>
    %288 = vector.extract_strided_slice %278 {offsets = [0, 96], sizes = [2, 32], strides = [1, 1]} : vector<2x128xf32> to vector<2x32xf32>
    %289 = math.tanh %288 : vector<2x32xf32>
    %290 = arith.mulf %286, %235 : vector<2x32xf32>
    %291 = arith.mulf %285, %289 : vector<2x32xf32>
    %292 = arith.addf %290, %291 : vector<2x32xf32>
    %293 = math.tanh %292 : vector<2x32xf32>
    %294 = arith.mulf %287, %293 : vector<2x32xf32>
    %cst_63 = arith.constant dense<0.000000e+00> : vector<2x4xf32>
    %295 = tpu.matmul %294, %16, %cst_63 {dimension_numbers = #tpu.dot_dimension_numbers<[1], [0], [0], [1], [0, 0, 1, 1], [], []>} : vector<2x32xf32>, vector<32x4xf32>, vector<2x4xf32> -> vector<2x4xf32>
    %296 = vector.broadcast %17 : vector<1x4xf32> to vector<2x4xf32>
    %297 = arith.addf %295, %296 : vector<2x4xf32>
    %cst_64 = arith.constant dense<0.000000e+00> : vector<2x4xf32>
    %298 = tpu.matmul %294, %18, %cst_64 {dimension_numbers = #tpu.dot_dimension_numbers<[1], [0], [0], [1], [0, 0, 1, 1], [], []>} : vector<2x32xf32>, vector<32x4xf32>, vector<2x4xf32> -> vector<2x4xf32>
    %299 = vector.broadcast %19 : vector<1x4xf32> to vector<2x4xf32>
    %300 = arith.addf %298, %299 : vector<2x4xf32>
    %cst_65 = arith.constant 5.000000e-01 : f32
    %301 = vector.broadcast %cst_65 : f32 to vector<2x4xf32>
    %302 = arith.mulf %300, %301 : vector<2x4xf32>
    %303 = math.exp %302 : vector<2x4xf32>
    %304 = vector.extract_strided_slice %11 {offsets = [5, 0, 0], sizes = [1, 2, 4], strides = [1, 1, 1]} : vector<8x2x4xf32> to vector<1x2x4xf32>
    %305 = vector.shape_cast %304 : vector<1x2x4xf32> to vector<2x4xf32>
    %306 = arith.mulf %303, %305 : vector<2x4xf32>
    %307 = arith.addf %297, %306 : vector<2x4xf32>
    %cst_66 = arith.constant dense<0.000000e+00> : vector<2x128xf32>
    %308 = tpu.matmul %250, %14, %cst_66 {dimension_numbers = #tpu.dot_dimension_numbers<[1], [0], [0], [1], [0, 0, 1, 1], [], []>} : vector<2x4xf32>, vector<4x128xf32>, vector<2x128xf32> -> vector<2x128xf32>
    %309 = vector.broadcast %15 : vector<1x128xf32> to vector<2x128xf32>
    %310 = arith.addf %308, %309 : vector<2x128xf32>
    %311 = vector.extract_strided_slice %10 {offsets = [3, 0, 0], sizes = [1, 2, 128], strides = [1, 1, 1]} : vector<8x2x128xf32> to vector<1x2x128xf32>
    %312 = vector.shape_cast %311 : vector<1x2x128xf32> to vector<2x128xf32>
    %313 = arith.addf %310, %312 : vector<2x128xf32>
    %cst_67 = arith.constant dense<0.000000e+00> : vector<2x128xf32>
    %314 = tpu.matmul %274, %13, %cst_67 {dimension_numbers = #tpu.dot_dimension_numbers<[1], [0], [0], [1], [0, 0, 1, 1], [], []>} : vector<2x32xf32>, vector<32x128xf32>, vector<2x128xf32> -> vector<2x128xf32>
    %315 = arith.addf %313, %314 : vector<2x128xf32>
    %316 = vector.extract_strided_slice %315 {offsets = [0, 0], sizes = [2, 96], strides = [1, 1]} : vector<2x128xf32> to vector<2x96xf32>
    %317 = arith.negf %316 : vector<2x96xf32>
    %318 = math.exp %317 : vector<2x96xf32>
    %cst_68 = arith.constant 1.000000e+00 : f32
    %319 = vector.broadcast %cst_68 : f32 to vector<2x96xf32>
    %320 = arith.addf %319, %318 : vector<2x96xf32>
    %321 = arith.divf %319, %320 : vector<2x96xf32>
    %322 = vector.extract_strided_slice %321 {offsets = [0, 0], sizes = [2, 32], strides = [1, 1]} : vector<2x96xf32> to vector<2x32xf32>
    %323 = vector.extract_strided_slice %321 {offsets = [0, 32], sizes = [2, 32], strides = [1, 1]} : vector<2x96xf32> to vector<2x32xf32>
    %324 = vector.extract_strided_slice %321 {offsets = [0, 64], sizes = [2, 32], strides = [1, 1]} : vector<2x96xf32> to vector<2x32xf32>
    %325 = vector.extract_strided_slice %315 {offsets = [0, 96], sizes = [2, 32], strides = [1, 1]} : vector<2x128xf32> to vector<2x32xf32>
    %326 = math.tanh %325 : vector<2x32xf32>
    %327 = arith.mulf %323, %272 : vector<2x32xf32>
    %328 = arith.mulf %322, %326 : vector<2x32xf32>
    %329 = arith.addf %327, %328 : vector<2x32xf32>
    %330 = math.tanh %329 : vector<2x32xf32>
    %331 = arith.mulf %324, %330 : vector<2x32xf32>
    %332 = vector.extract_strided_slice %8 {offsets = [6, 0, 0], sizes = [1, 2, 128], strides = [1, 1, 1]} : vector<8x2x128xf32> to vector<1x2x128xf32>
    %333 = vector.shape_cast %332 : vector<1x2x128xf32> to vector<2x128xf32>
    %cst_69 = arith.constant dense<0.000000e+00> : vector<2x128xf32>
    %334 = tpu.matmul %294, %12, %cst_69 {dimension_numbers = #tpu.dot_dimension_numbers<[1], [0], [0], [1], [0, 0, 1, 1], [], []>} : vector<2x32xf32>, vector<32x128xf32>, vector<2x128xf32> -> vector<2x128xf32>
    %335 = arith.addf %333, %334 : vector<2x128xf32>
    %336 = vector.extract_strided_slice %335 {offsets = [0, 0], sizes = [2, 96], strides = [1, 1]} : vector<2x128xf32> to vector<2x96xf32>
    %337 = arith.negf %336 : vector<2x96xf32>
    %338 = math.exp %337 : vector<2x96xf32>
    %cst_70 = arith.constant 1.000000e+00 : f32
    %339 = vector.broadcast %cst_70 : f32 to vector<2x96xf32>
    %340 = arith.addf %339, %338 : vector<2x96xf32>
    %341 = arith.divf %339, %340 : vector<2x96xf32>
    %342 = vector.extract_strided_slice %341 {offsets = [0, 0], sizes = [2, 32], strides = [1, 1]} : vector<2x96xf32> to vector<2x32xf32>
    %343 = vector.extract_strided_slice %341 {offsets = [0, 32], sizes = [2, 32], strides = [1, 1]} : vector<2x96xf32> to vector<2x32xf32>
    %344 = vector.extract_strided_slice %341 {offsets = [0, 64], sizes = [2, 32], strides = [1, 1]} : vector<2x96xf32> to vector<2x32xf32>
    %345 = vector.extract_strided_slice %335 {offsets = [0, 96], sizes = [2, 32], strides = [1, 1]} : vector<2x128xf32> to vector<2x32xf32>
    %346 = math.tanh %345 : vector<2x32xf32>
    %347 = arith.mulf %343, %292 : vector<2x32xf32>
    %348 = arith.mulf %342, %346 : vector<2x32xf32>
    %349 = arith.addf %347, %348 : vector<2x32xf32>
    %350 = math.tanh %349 : vector<2x32xf32>
    %351 = arith.mulf %344, %350 : vector<2x32xf32>
    %cst_71 = arith.constant dense<0.000000e+00> : vector<2x4xf32>
    %352 = tpu.matmul %351, %16, %cst_71 {dimension_numbers = #tpu.dot_dimension_numbers<[1], [0], [0], [1], [0, 0, 1, 1], [], []>} : vector<2x32xf32>, vector<32x4xf32>, vector<2x4xf32> -> vector<2x4xf32>
    %353 = vector.broadcast %17 : vector<1x4xf32> to vector<2x4xf32>
    %354 = arith.addf %352, %353 : vector<2x4xf32>
    %cst_72 = arith.constant dense<0.000000e+00> : vector<2x4xf32>
    %355 = tpu.matmul %351, %18, %cst_72 {dimension_numbers = #tpu.dot_dimension_numbers<[1], [0], [0], [1], [0, 0, 1, 1], [], []>} : vector<2x32xf32>, vector<32x4xf32>, vector<2x4xf32> -> vector<2x4xf32>
    %356 = vector.broadcast %19 : vector<1x4xf32> to vector<2x4xf32>
    %357 = arith.addf %355, %356 : vector<2x4xf32>
    %cst_73 = arith.constant 5.000000e-01 : f32
    %358 = vector.broadcast %cst_73 : f32 to vector<2x4xf32>
    %359 = arith.mulf %357, %358 : vector<2x4xf32>
    %360 = math.exp %359 : vector<2x4xf32>
    %361 = vector.extract_strided_slice %11 {offsets = [6, 0, 0], sizes = [1, 2, 4], strides = [1, 1, 1]} : vector<8x2x4xf32> to vector<1x2x4xf32>
    %362 = vector.shape_cast %361 : vector<1x2x4xf32> to vector<2x4xf32>
    %363 = arith.mulf %360, %362 : vector<2x4xf32>
    %364 = arith.addf %354, %363 : vector<2x4xf32>
    %cst_74 = arith.constant dense<0.000000e+00> : vector<2x128xf32>
    %365 = tpu.matmul %307, %14, %cst_74 {dimension_numbers = #tpu.dot_dimension_numbers<[1], [0], [0], [1], [0, 0, 1, 1], [], []>} : vector<2x4xf32>, vector<4x128xf32>, vector<2x128xf32> -> vector<2x128xf32>
    %366 = vector.broadcast %15 : vector<1x128xf32> to vector<2x128xf32>
    %367 = arith.addf %365, %366 : vector<2x128xf32>
    %368 = vector.extract_strided_slice %10 {offsets = [4, 0, 0], sizes = [1, 2, 128], strides = [1, 1, 1]} : vector<8x2x128xf32> to vector<1x2x128xf32>
    %369 = vector.shape_cast %368 : vector<1x2x128xf32> to vector<2x128xf32>
    %370 = arith.addf %367, %369 : vector<2x128xf32>
    %cst_75 = arith.constant dense<0.000000e+00> : vector<2x128xf32>
    %371 = tpu.matmul %331, %13, %cst_75 {dimension_numbers = #tpu.dot_dimension_numbers<[1], [0], [0], [1], [0, 0, 1, 1], [], []>} : vector<2x32xf32>, vector<32x128xf32>, vector<2x128xf32> -> vector<2x128xf32>
    %372 = arith.addf %370, %371 : vector<2x128xf32>
    %373 = vector.extract_strided_slice %372 {offsets = [0, 0], sizes = [2, 96], strides = [1, 1]} : vector<2x128xf32> to vector<2x96xf32>
    %374 = arith.negf %373 : vector<2x96xf32>
    %375 = math.exp %374 : vector<2x96xf32>
    %cst_76 = arith.constant 1.000000e+00 : f32
    %376 = vector.broadcast %cst_76 : f32 to vector<2x96xf32>
    %377 = arith.addf %376, %375 : vector<2x96xf32>
    %378 = arith.divf %376, %377 : vector<2x96xf32>
    %379 = vector.extract_strided_slice %378 {offsets = [0, 0], sizes = [2, 32], strides = [1, 1]} : vector<2x96xf32> to vector<2x32xf32>
    %380 = vector.extract_strided_slice %378 {offsets = [0, 32], sizes = [2, 32], strides = [1, 1]} : vector<2x96xf32> to vector<2x32xf32>
    %381 = vector.extract_strided_slice %378 {offsets = [0, 64], sizes = [2, 32], strides = [1, 1]} : vector<2x96xf32> to vector<2x32xf32>
    %382 = vector.extract_strided_slice %372 {offsets = [0, 96], sizes = [2, 32], strides = [1, 1]} : vector<2x128xf32> to vector<2x32xf32>
    %383 = math.tanh %382 : vector<2x32xf32>
    %384 = arith.mulf %380, %329 : vector<2x32xf32>
    %385 = arith.mulf %379, %383 : vector<2x32xf32>
    %386 = arith.addf %384, %385 : vector<2x32xf32>
    %387 = math.tanh %386 : vector<2x32xf32>
    %388 = arith.mulf %381, %387 : vector<2x32xf32>
    %389 = vector.extract_strided_slice %8 {offsets = [7, 0, 0], sizes = [1, 2, 128], strides = [1, 1, 1]} : vector<8x2x128xf32> to vector<1x2x128xf32>
    %390 = vector.shape_cast %389 : vector<1x2x128xf32> to vector<2x128xf32>
    %cst_77 = arith.constant dense<0.000000e+00> : vector<2x128xf32>
    %391 = tpu.matmul %351, %12, %cst_77 {dimension_numbers = #tpu.dot_dimension_numbers<[1], [0], [0], [1], [0, 0, 1, 1], [], []>} : vector<2x32xf32>, vector<32x128xf32>, vector<2x128xf32> -> vector<2x128xf32>
    %392 = arith.addf %390, %391 : vector<2x128xf32>
    %393 = vector.extract_strided_slice %392 {offsets = [0, 0], sizes = [2, 96], strides = [1, 1]} : vector<2x128xf32> to vector<2x96xf32>
    %394 = arith.negf %393 : vector<2x96xf32>
    %395 = math.exp %394 : vector<2x96xf32>
    %cst_78 = arith.constant 1.000000e+00 : f32
    %396 = vector.broadcast %cst_78 : f32 to vector<2x96xf32>
    %397 = arith.addf %396, %395 : vector<2x96xf32>
    %398 = arith.divf %396, %397 : vector<2x96xf32>
    %399 = vector.extract_strided_slice %398 {offsets = [0, 0], sizes = [2, 32], strides = [1, 1]} : vector<2x96xf32> to vector<2x32xf32>
    %400 = vector.extract_strided_slice %398 {offsets = [0, 32], sizes = [2, 32], strides = [1, 1]} : vector<2x96xf32> to vector<2x32xf32>
    %401 = vector.extract_strided_slice %398 {offsets = [0, 64], sizes = [2, 32], strides = [1, 1]} : vector<2x96xf32> to vector<2x32xf32>
    %402 = vector.extract_strided_slice %392 {offsets = [0, 96], sizes = [2, 32], strides = [1, 1]} : vector<2x128xf32> to vector<2x32xf32>
    %403 = math.tanh %402 : vector<2x32xf32>
    %404 = arith.mulf %400, %349 : vector<2x32xf32>
    %405 = arith.mulf %399, %403 : vector<2x32xf32>
    %406 = arith.addf %404, %405 : vector<2x32xf32>
    %407 = math.tanh %406 : vector<2x32xf32>
    %408 = arith.mulf %401, %407 : vector<2x32xf32>
    %cst_79 = arith.constant dense<0.000000e+00> : vector<2x4xf32>
    %409 = tpu.matmul %408, %16, %cst_79 {dimension_numbers = #tpu.dot_dimension_numbers<[1], [0], [0], [1], [0, 0, 1, 1], [], []>} : vector<2x32xf32>, vector<32x4xf32>, vector<2x4xf32> -> vector<2x4xf32>
    %410 = vector.broadcast %17 : vector<1x4xf32> to vector<2x4xf32>
    %411 = arith.addf %409, %410 : vector<2x4xf32>
    %cst_80 = arith.constant dense<0.000000e+00> : vector<2x4xf32>
    %412 = tpu.matmul %408, %18, %cst_80 {dimension_numbers = #tpu.dot_dimension_numbers<[1], [0], [0], [1], [0, 0, 1, 1], [], []>} : vector<2x32xf32>, vector<32x4xf32>, vector<2x4xf32> -> vector<2x4xf32>
    %413 = vector.broadcast %19 : vector<1x4xf32> to vector<2x4xf32>
    %414 = arith.addf %412, %413 : vector<2x4xf32>
    %cst_81 = arith.constant 5.000000e-01 : f32
    %415 = vector.broadcast %cst_81 : f32 to vector<2x4xf32>
    %416 = arith.mulf %414, %415 : vector<2x4xf32>
    %417 = math.exp %416 : vector<2x4xf32>
    %418 = vector.extract_strided_slice %11 {offsets = [7, 0, 0], sizes = [1, 2, 4], strides = [1, 1, 1]} : vector<8x2x4xf32> to vector<1x2x4xf32>
    %419 = vector.shape_cast %418 : vector<1x2x4xf32> to vector<2x4xf32>
    %420 = arith.mulf %417, %419 : vector<2x4xf32>
    %421 = arith.addf %411, %420 : vector<2x4xf32>
    %cst_82 = arith.constant dense<0.000000e+00> : vector<2x128xf32>
    %422 = tpu.matmul %364, %14, %cst_82 {dimension_numbers = #tpu.dot_dimension_numbers<[1], [0], [0], [1], [0, 0, 1, 1], [], []>} : vector<2x4xf32>, vector<4x128xf32>, vector<2x128xf32> -> vector<2x128xf32>
    %423 = vector.broadcast %15 : vector<1x128xf32> to vector<2x128xf32>
    %424 = arith.addf %422, %423 : vector<2x128xf32>
    %425 = vector.extract_strided_slice %10 {offsets = [5, 0, 0], sizes = [1, 2, 128], strides = [1, 1, 1]} : vector<8x2x128xf32> to vector<1x2x128xf32>
    %426 = vector.shape_cast %425 : vector<1x2x128xf32> to vector<2x128xf32>
    %427 = arith.addf %424, %426 : vector<2x128xf32>
    %cst_83 = arith.constant dense<0.000000e+00> : vector<2x128xf32>
    %428 = tpu.matmul %388, %13, %cst_83 {dimension_numbers = #tpu.dot_dimension_numbers<[1], [0], [0], [1], [0, 0, 1, 1], [], []>} : vector<2x32xf32>, vector<32x128xf32>, vector<2x128xf32> -> vector<2x128xf32>
    %429 = arith.addf %427, %428 : vector<2x128xf32>
    %430 = vector.extract_strided_slice %429 {offsets = [0, 0], sizes = [2, 96], strides = [1, 1]} : vector<2x128xf32> to vector<2x96xf32>
    %431 = arith.negf %430 : vector<2x96xf32>
    %432 = math.exp %431 : vector<2x96xf32>
    %cst_84 = arith.constant 1.000000e+00 : f32
    %433 = vector.broadcast %cst_84 : f32 to vector<2x96xf32>
    %434 = arith.addf %433, %432 : vector<2x96xf32>
    %435 = arith.divf %433, %434 : vector<2x96xf32>
    %436 = vector.extract_strided_slice %435 {offsets = [0, 0], sizes = [2, 32], strides = [1, 1]} : vector<2x96xf32> to vector<2x32xf32>
    %437 = vector.extract_strided_slice %435 {offsets = [0, 32], sizes = [2, 32], strides = [1, 1]} : vector<2x96xf32> to vector<2x32xf32>
    %438 = vector.extract_strided_slice %435 {offsets = [0, 64], sizes = [2, 32], strides = [1, 1]} : vector<2x96xf32> to vector<2x32xf32>
    %439 = vector.extract_strided_slice %429 {offsets = [0, 96], sizes = [2, 32], strides = [1, 1]} : vector<2x128xf32> to vector<2x32xf32>
    %440 = math.tanh %439 : vector<2x32xf32>
    %441 = arith.mulf %437, %386 : vector<2x32xf32>
    %442 = arith.mulf %436, %440 : vector<2x32xf32>
    %443 = arith.addf %441, %442 : vector<2x32xf32>
    %444 = math.tanh %443 : vector<2x32xf32>
    %445 = arith.mulf %438, %444 : vector<2x32xf32>
    %cst_85 = arith.constant dense<0.000000e+00> : vector<2x128xf32>
    %446 = tpu.matmul %421, %14, %cst_85 {dimension_numbers = #tpu.dot_dimension_numbers<[1], [0], [0], [1], [0, 0, 1, 1], [], []>} : vector<2x4xf32>, vector<4x128xf32>, vector<2x128xf32> -> vector<2x128xf32>
    %447 = vector.broadcast %15 : vector<1x128xf32> to vector<2x128xf32>
    %448 = arith.addf %446, %447 : vector<2x128xf32>
    %449 = vector.extract_strided_slice %10 {offsets = [6, 0, 0], sizes = [1, 2, 128], strides = [1, 1, 1]} : vector<8x2x128xf32> to vector<1x2x128xf32>
    %450 = vector.shape_cast %449 : vector<1x2x128xf32> to vector<2x128xf32>
    %451 = arith.addf %448, %450 : vector<2x128xf32>
    %cst_86 = arith.constant dense<0.000000e+00> : vector<2x128xf32>
    %452 = tpu.matmul %445, %13, %cst_86 {dimension_numbers = #tpu.dot_dimension_numbers<[1], [0], [0], [1], [0, 0, 1, 1], [], []>} : vector<2x32xf32>, vector<32x128xf32>, vector<2x128xf32> -> vector<2x128xf32>
    %453 = arith.addf %451, %452 : vector<2x128xf32>
    %454 = vector.extract_strided_slice %453 {offsets = [0, 0], sizes = [2, 96], strides = [1, 1]} : vector<2x128xf32> to vector<2x96xf32>
    %455 = arith.negf %454 : vector<2x96xf32>
    %456 = math.exp %455 : vector<2x96xf32>
    %cst_87 = arith.constant 1.000000e+00 : f32
    %457 = vector.broadcast %cst_87 : f32 to vector<2x96xf32>
    %458 = arith.addf %457, %456 : vector<2x96xf32>
    %459 = arith.divf %457, %458 : vector<2x96xf32>
    %460 = vector.extract_strided_slice %459 {offsets = [0, 0], sizes = [2, 32], strides = [1, 1]} : vector<2x96xf32> to vector<2x32xf32>
    %461 = vector.extract_strided_slice %459 {offsets = [0, 32], sizes = [2, 32], strides = [1, 1]} : vector<2x96xf32> to vector<2x32xf32>
    %462 = vector.extract_strided_slice %459 {offsets = [0, 64], sizes = [2, 32], strides = [1, 1]} : vector<2x96xf32> to vector<2x32xf32>
    %463 = vector.extract_strided_slice %453 {offsets = [0, 96], sizes = [2, 32], strides = [1, 1]} : vector<2x128xf32> to vector<2x32xf32>
    %464 = math.tanh %463 : vector<2x32xf32>
    %465 = arith.mulf %461, %443 : vector<2x32xf32>
    %466 = arith.mulf %460, %464 : vector<2x32xf32>
    %467 = arith.addf %465, %466 : vector<2x32xf32>
    %468 = math.tanh %467 : vector<2x32xf32>
    %469 = arith.mulf %462, %468 : vector<2x32xf32>
    %470 = vector.shape_cast %38 : vector<2x32xf32> to vector<1x2x32xf32>
    %471 = vector.shape_cast %71 : vector<2x32xf32> to vector<1x2x32xf32>
    %472 = vector.shape_cast %123 : vector<2x32xf32> to vector<1x2x32xf32>
    %473 = vector.shape_cast %180 : vector<2x32xf32> to vector<1x2x32xf32>
    %474 = vector.shape_cast %237 : vector<2x32xf32> to vector<1x2x32xf32>
    %475 = vector.shape_cast %294 : vector<2x32xf32> to vector<1x2x32xf32>
    %476 = vector.shape_cast %351 : vector<2x32xf32> to vector<1x2x32xf32>
    %477 = vector.shape_cast %408 : vector<2x32xf32> to vector<1x2x32xf32>
    %478 = tpu.concatenate %470, %471, %472, %473, %474, %475, %476, %477 in 0 : vector<1x2x32xf32>, vector<1x2x32xf32>, vector<1x2x32xf32>, vector<1x2x32xf32>, vector<1x2x32xf32>, vector<1x2x32xf32>, vector<1x2x32xf32>, vector<1x2x32xf32> -> vector<8x2x32xf32>
    %479 = vector.shape_cast %478 : vector<8x2x32xf32> to vector<16x32xf32>
    %480 = vector.shape_cast %103 : vector<2x32xf32> to vector<1x2x32xf32>
    %481 = vector.shape_cast %160 : vector<2x32xf32> to vector<1x2x32xf32>
    %482 = vector.shape_cast %217 : vector<2x32xf32> to vector<1x2x32xf32>
    %483 = vector.shape_cast %274 : vector<2x32xf32> to vector<1x2x32xf32>
    %484 = vector.shape_cast %331 : vector<2x32xf32> to vector<1x2x32xf32>
    %485 = vector.shape_cast %388 : vector<2x32xf32> to vector<1x2x32xf32>
    %486 = vector.shape_cast %445 : vector<2x32xf32> to vector<1x2x32xf32>
    %487 = vector.shape_cast %469 : vector<2x32xf32> to vector<1x2x32xf32>
    %488 = tpu.concatenate %480, %481, %482, %483, %484, %485, %486, %487 in 0 : vector<1x2x32xf32>, vector<1x2x32xf32>, vector<1x2x32xf32>, vector<1x2x32xf32>, vector<1x2x32xf32>, vector<1x2x32xf32>, vector<1x2x32xf32>, vector<1x2x32xf32> -> vector<8x2x32xf32>
    %489 = vector.shape_cast %488 : vector<8x2x32xf32> to vector<16x32xf32>
    %c0_88 = arith.constant 0 : index
    %c0_89 = arith.constant 0 : index
    %490 = vector.load %arg13[%c0_88, %c0_89] : memref<32x16xf32, #tpu.memory_space<vmem>>, vector<32x16xf32>
    %cst_90 = arith.constant dense<0.000000e+00> : vector<16x16xf32>
    %491 = tpu.matmul %479, %490, %cst_90 {dimension_numbers = #tpu.dot_dimension_numbers<[1], [0], [0], [1], [0, 0, 1, 1], [], []>} : vector<16x32xf32>, vector<32x16xf32>, vector<16x16xf32> -> vector<16x16xf32>
    %c0_91 = arith.constant 0 : index
    %c0_92 = arith.constant 0 : index
    %492 = vector.load %arg14[%c0_91, %c0_92] : memref<32x16xf32, #tpu.memory_space<vmem>>, vector<32x16xf32>
    %cst_93 = arith.constant dense<0.000000e+00> : vector<16x16xf32>
    %493 = tpu.matmul %489, %492, %cst_93 {dimension_numbers = #tpu.dot_dimension_numbers<[1], [0], [0], [1], [0, 0, 1, 1], [], []>} : vector<16x32xf32>, vector<32x16xf32>, vector<16x16xf32> -> vector<16x16xf32>
    %494 = arith.addf %491, %493 : vector<16x16xf32>
    %c0_94 = arith.constant 0 : index
    %c0_95 = arith.constant 0 : index
    %495 = vector.load %arg15[%c0_94, %c0_95] : memref<1x16xf32, #tpu.memory_space<vmem>>, vector<1x16xf32>
    %496 = vector.broadcast %495 : vector<1x16xf32> to vector<16x16xf32>
    %497 = arith.addf %494, %496 : vector<16x16xf32>
    %498 = vector.shape_cast %497 : vector<16x16xf32> to vector<8x2x16xf32>
    %c0_96 = arith.constant 0 : index
    %c0_97 = arith.constant 0 : index
    %c0_98 = arith.constant 0 : index
    %499 = vector.load %arg16[%c0_96, %c0_97, %c0_98] : memref<8x2x16xf32, #tpu.memory_space<vmem>>, vector<8x2x16xf32>
    tpu.vector_store %arg16[%c0_96, %c0_97, %c0_98], %498 {strides = array<i32>} : memref<8x2x16xf32, #tpu.memory_space<vmem>>, vector<8x2x16xf32>,
    return
  }
  func.func @transform_0(%arg0: i32) -> (i32, i32, i32) {
    %c0_i32 = arith.constant 0 : i32
    %c0_i32_0 = arith.constant 0 : i32
    %c0_i32_1 = arith.constant 0 : i32
    return %c0_i32, %arg0, %c0_i32_0 : i32, i32, i32
  }
  func.func @transform_1(%arg0: i32) -> (i32, i32, i32) {
    %c0_i32 = arith.constant 0 : i32
    %c0_i32_0 = arith.constant 0 : i32
    %c0_i32_1 = arith.constant 0 : i32
    return %c0_i32, %arg0, %c0_i32_0 : i32, i32, i32
  }
  func.func @transform_2(%arg0: i32) -> (i32, i32) {
    %c0_i32 = arith.constant 0 : i32
    %c0_i32_0 = arith.constant 0 : i32
    %c0_i32_1 = arith.constant 0 : i32
    return %c0_i32, %c0_i32_0 : i32, i32
  }
  func.func @transform_3(%arg0: i32) -> (i32, i32) {
    %c0_i32 = arith.constant 0 : i32
    %c0_i32_0 = arith.constant 0 : i32
    %c0_i32_1 = arith.constant 0 : i32
    return %c0_i32, %c0_i32_0 : i32, i32
  }
  func.func @transform_4(%arg0: i32) -> (i32, i32) {
    %c0_i32 = arith.constant 0 : i32
    %c0_i32_0 = arith.constant 0 : i32
    %c0_i32_1 = arith.constant 0 : i32
    return %c0_i32, %c0_i32_0 : i32, i32
  }
  func.func @transform_5(%arg0: i32) -> (i32, i32) {
    %c0_i32 = arith.constant 0 : i32
    %c0_i32_0 = arith.constant 0 : i32
    %c0_i32_1 = arith.constant 0 : i32
    return %c0_i32, %c0_i32_0 : i32, i32
  }
  func.func @transform_6(%arg0: i32) -> (i32, i32) {
    %c0_i32 = arith.constant 0 : i32
    %c0_i32_0 = arith.constant 0 : i32
    %c0_i32_1 = arith.constant 0 : i32
    return %c0_i32, %c0_i32_0 : i32, i32
  }
  func.func @transform_7(%arg0: i32) -> (i32, i32) {
    %c0_i32 = arith.constant 0 : i32
    %c0_i32_0 = arith.constant 0 : i32
    %c0_i32_1 = arith.constant 0 : i32
    return %c0_i32, %c0_i32_0 : i32, i32
  }
  func.func @transform_8(%arg0: i32) -> (i32, i32) {
    %c0_i32 = arith.constant 0 : i32
    %c0_i32_0 = arith.constant 0 : i32
    %c0_i32_1 = arith.constant 0 : i32
    return %c0_i32, %c0_i32_0 : i32, i32
  }
  func.func @transform_9(%arg0: i32) -> (i32, i32) {
    %c0_i32 = arith.constant 0 : i32
    %c0_i32_0 = arith.constant 0 : i32
    %c0_i32_1 = arith.constant 0 : i32
    return %c0_i32, %c0_i32_0 : i32, i32
  }
  func.func @transform_10(%arg0: i32) -> (i32, i32) {
    %c0_i32 = arith.constant 0 : i32
    %c0_i32_0 = arith.constant 0 : i32
    %c0_i32_1 = arith.constant 0 : i32
    return %c0_i32, %c0_i32_0 : i32, i32
  }
  func.func @transform_11(%arg0: i32) -> (i32, i32) {
    %c0_i32 = arith.constant 0 : i32
    %c0_i32_0 = arith.constant 0 : i32
    %c0_i32_1 = arith.constant 0 : i32
    return %c0_i32, %c0_i32_0 : i32, i32
  }
  func.func @transform_12(%arg0: i32) -> (i32, i32) {
    %c0_i32 = arith.constant 0 : i32
    %c0_i32_0 = arith.constant 0 : i32
    %c0_i32_1 = arith.constant 0 : i32
    return %c0_i32, %c0_i32_0 : i32, i32
  }
  func.func @transform_13(%arg0: i32) -> (i32, i32) {
    %c0_i32 = arith.constant 0 : i32
    %c0_i32_0 = arith.constant 0 : i32
    %c0_i32_1 = arith.constant 0 : i32
    return %c0_i32, %c0_i32_0 : i32, i32
  }
  func.func @transform_14(%arg0: i32) -> (i32, i32) {
    %c0_i32 = arith.constant 0 : i32
    %c0_i32_0 = arith.constant 0 : i32
    %c0_i32_1 = arith.constant 0 : i32
    return %c0_i32, %c0_i32_0 : i32, i32
  }
  func.func @transform_15(%arg0: i32) -> (i32, i32, i32) {
    %c0_i32 = arith.constant 0 : i32
    %c0_i32_0 = arith.constant 0 : i32
    %c0_i32_1 = arith.constant 0 : i32
    return %c0_i32, %arg0, %c0_i32_0 : i32, i32, i32
  }
}

</mosaic_0001>

<bundles_post_ra>
// kernel: nvl_pallas.1
= control target key start
LH: loop header
LB: loop body
LE: loop exit
PB: predicated region body
PF: predicated region fallthrough
CT: control target
= control target key end

     0   :  { %vm93_vm0 = vcmask 1043456   ;;  %vm88_vm1 = vcmask 31744   ;;  %s2217_s29 = smov 64   ;;  %vm249_vm6 = vcmask 261120   ;;  %s3003_s0 = inlined_call_operand.vmem [shape: f32[8,2,4], index: 0, kind: input, shape index: {}]   ;;  %s3004_s3 = inlined_call_operand.vmem [shape: f32[1,128], index: 3, kind: input, shape index: {}]   ;;  %s3005_s2 = inlined_call_operand.vmem [shape: f32[4,256], index: 2, kind: input, shape index: {}]   ;;  %s3006_s7 = inlined_call_operand.vmem [shape: f32[32,4], index: 7, kind: input, shape index: {}]   ;;  %s3007_s8 = inlined_call_operand.vmem [shape: f32[1,4], index: 8, kind: input, shape index: {}]   ;;  %s3008_s5 = inlined_call_operand.vmem [shape: f32[32,4], index: 5, kind: input, shape index: {}]   ;;  %s3009_s4 = inlined_call_operand.vmem [shape: f32[32,128], index: 4, kind: input, shape index: {}]   ;;  %s3010_s6 = inlined_call_operand.vmem [shape: f32[1,4], index: 6, kind: input, shape index: {}]   ;;  %s3011_s9 = inlined_call_operand.vmem [shape: f32[4,128], index: 9, kind: input, shape index: {}]   ;;  %s3012_s1 = inlined_call_operand.vmem [shape: f32[8,2,4], index: 1, kind: input, shape index: {}]   ;;  %s3013_s10 = inlined_call_operand.vmem [shape: f32[1,128], index: 10, kind: input, shape index: {}]   ;;  %s3014_s11 = inlined_call_operand.vmem [shape: f32[32,128], index: 11, kind: input, shape index: {}]   ;;  %s3015_s13 = inlined_call_operand.vmem [shape: f32[32,16], index: 13, kind: input, shape index: {}]   ;;  %s3016_s12 = inlined_call_operand.vmem [shape: f32[32,16], index: 12, kind: input, shape index: {}]   ;;  %s3017_s14 = inlined_call_operand.vmem [shape: f32[1,16], index: 14, kind: input, shape index: {}]   ;;  %s3018_s15 = inlined_call_operand.vmem [shape: f32[8,2,16], index: 15, kind: output, shape index: {}]  }
   0x1   :  { %v50_v0 = vld [vmem:[%s3003_s0] sm:$0x3]  ;;  %v51_v1 = vld [vmem:[%s3003_s0 + $0x2] sm:$0x3]  ;;  %v52_v2 = vld [vmem:[%s3003_s0 + $0x4] sm:$0x3] }
   0x2   :  { %v53_v3 = vld [vmem:[%s3003_s0 + $0x6] sm:$0x3]  ;;  %67 = vst [vmem:[#allocation1] ss:$4 sm:$0xff] %v50_v0  ;;  %v2318_v7 = vld [vmem:[%s3004_s3] ss:$0 sm:$0xff] }
   0x3   :  { %69 = vst [vmem:[#allocation1 + $0x1] ss:$4 sm:$0xff] %v51_v1  ;;  %v58_v4 = vld [vmem:[%s3005_s2] sm:$0xff]  ;;  %s2216_s2 = smov 32   ;;  %v54_v31 = vld [vmem:[%s3003_s0 + $0x8] sm:$0x3] }
   0x4   :  { %71 = vst [vmem:[#allocation1 + $0x2] ss:$4 sm:$0xff] %v52_v2  ;;  %v55_v32 = vld [vmem:[%s3003_s0 + $0xa] sm:$0x3]  ;;  %v56_v33 = vld [vmem:[%s3003_s0 + $0xc] sm:$0x3] }
   0x5   :  { %73 = vst [vmem:[#allocation1 + $0x3] ss:$4 sm:$0xff] %v53_v3  ;;  %v57_v34 = vld [vmem:[%s3003_s0 + $0xe] sm:$0x3]  ;;  %v2348_v35 = vld [vmem:[%s3006_s7 + $0x18] sm:$0xff]  ;;  %v2353_v36 = vld [vmem:[%s3006_s7 + $0x10] sm:$0xff] }
   0x6   :  { %75 = vst [vmem:[#allocation1 + $0x20] ss:$4 sm:$0xff] %v54_v31  ;;  %v2359_v37 = vld [vmem:[%s3006_s7 + $0x8] sm:$0xff]  ;;  %v2365_v39 = vld [vmem:[%s3006_s7] sm:$0xff]  ;;  %v2382_v45 = vld [vmem:[%s3008_s5 + $0x18] sm:$0xff] }
   0x7   :  { %77 = vst [vmem:[#allocation1 + $0x21] ss:$4 sm:$0xff] %v55_v32  ;;  %v2387_v46 = vld [vmem:[%s3008_s5 + $0x10] sm:$0xff]  ;;  %389 = vmatpush.msra.mxu3 %v2382_v45  ;;  %v2394_v47 = vld [vmem:[%s3008_s5 + $0x8] sm:$0xff]  ;;  %v2401_v48 = vld [vmem:[%s3008_s5] sm:$0xff] }
   0x8   :  { %79 = vst [vmem:[#allocation1 + $0x22] ss:$4 sm:$0xff] %v56_v33  ;;  %v2418_v49 = vld [vmem:[%s3009_s4 + $0x18] sm:$0xff]  ;;  %v2423_v50 = vld [vmem:[%s3009_s4 + $0x10] sm:$0xff]  ;;  %v2429_v51 = vld [vmem:[%s3009_s4 + $0x8] sm:$0xff] }
   0x9   :  { %81 = vst [vmem:[#allocation1 + $0x23] ss:$4 sm:$0xff] %v57_v34  ;;  %390 = vmatpush.msra.mxu3 %v2387_v46  ;;  %324 = vmatpush.msra.mxu2 %v2418_v49  ;;  %v2435_v52 = vld [vmem:[%s3009_s4] sm:$0xff] }
   0xa   :  { %v2455_v57 = vld [vmem:[%s3011_s9] sm:$0xf] }
   0xb   :  { %391 = vmatpush.msra.mxu3 %v2394_v47  ;;  %325 = vmatpush.msra.mxu2 %v2423_v50  ;;  %v2466_v59 = vld [vmem:[%s3007_s8] ss:$0 sm:$0xff] }
   0xc   :  { %v82_v5 = vld.sshfl [vmem:[#allocation1] sm:$0xff pattern:$0x73625140] }
   0xd   :  { %85 = vst [vmem:[#allocation1] ss:$2 sm:$0xff] %v58_v4  ;;  %392 = vmatpush.msra.mxu3 %v2401_v48  ;;  %326 = vmatpush.msra.mxu2 %v2429_v51  ;;  %v2474_v1 = vld [vmem:[%s3010_s6] ss:$0 sm:$0xff] }
   0xe   :  { %v176_v3 = vld [vmem:[%s3012_s1] sm:$0x3] }
   0xf   :  { %577 = vmatpush.msrb.mxu3 %v2382_v45  ;;  %327 = vmatpush.msra.mxu2 %v2435_v52 }
  0x10   :  { %v83_v41 = vld.sshfl [vmem:[#allocation1 + $0x20] sm:$0xff pattern:$0x73625140] }
  0x11   :  { %578 = vmatpush.msrb.mxu3 %v2387_v46  ;;  %512 = vmatpush.msrb.mxu2 %v2418_v49 }
  0x13   :  { %579 = vmatpush.msrb.mxu3 %v2394_v47  ;;  %513 = vmatpush.msrb.mxu2 %v2423_v50 }
  0x14   :  { %v86_v6 = vld.sshfl [vmem:[#allocation1] sm:$0xff pattern:$0x75316420]  ;;  %v87_v26 = vld.sshfl [vmem:[#allocation1 + $0x8] sm:$0xff pattern:$0x75316420] }
  0x15   :  { %1973 = vmatpush.msk.msra.mxu0 %vm93_vm0, %v86_v6  ;;  %1976 = vmatpush.msk.msra.mxu1 %vm93_vm0, %v87_v26 }
  0x16   :  { %1974 = vmatmul.msk.f32.vlgmr.msra.gmra.mxu0 %vm88_vm1, %v82_v5  ;;  %1977 = vmatmul.msk.f32.vlgmr.msra.gmra.mxu1 %vm88_vm1, %v82_v5 }
  0x17   :  { %293 = vmatpush.msrb.mxu1 %v2348_v35  ;;  %264 = vmatpush.msrb.mxu0 %v2382_v45 }
  0x18   :  { %580 = vmatpush.msrb.mxu3 %v2401_v48  ;;  %514 = vmatpush.msrb.mxu2 %v2429_v51 }
  0x19   :  { %294 = vmatpush.msrb.mxu1 %v2353_v36  ;;  %265 = vmatpush.msrb.mxu0 %v2387_v46 }
  0x1a   :  { %515 = vmatpush.msrb.mxu2 %v2435_v52 }
  0x1b   :  { %295 = vmatpush.msrb.mxu1 %v2359_v37  ;;  %266 = vmatpush.msrb.mxu0 %v2394_v47 }
  0x1d   :  { %296 = vmatpush.msrb.mxu1 %v2365_v39  ;;  %267 = vmatpush.msrb.mxu0 %v2401_v48 }
  0x1e   :  { %1978 = vmatmul.msk.f32.gmra.mxu1 %vm88_vm1, %v83_v41  ;;  %1975 = vmatmul.msk.f32.gmra.mxu0 %vm88_vm1, %v83_v41 }
  0x1f   :  { %415 = vmatpush.msra.mxu0 %v2348_v35  ;;  %1986 = vmatpush.msk.msra.mxu1 %vm93_vm0, %v2455_v57 }
  0x21   :  { %416 = vmatpush.msra.mxu0 %v2353_v36 }
  0x23   :  { %417 = vmatpush.msra.mxu0 %v2359_v37 }
  0x25   :  { %418 = vmatpush.msra.mxu0 %v2365_v39 }
  0x93   :  { %v115_v8 = vpop.f32.mrf.mxu0  ;;  %v2450_v56 = vpop.f32.mrf.mxu1 }
  0x94   :  { %v2321_v9 = vadd.f32 %v2318_v7, %v115_v8 }
  0x96   :  { %2052 = vtanh.f32 %v2321_v9  ;;  %v1979_v11 = vmul.f32 -1.442695, %v2321_v9 }
  0x98   :  { %2054 = vpow2.f32 %v1979_v11 }
  0x9b   :  { %v2461_v58 = vpop.f32.mrf.mxu1  ;;  %v2469_v0 = vpop.f32.mrf.mxu0 }
  0x9c   :  { %v2053_v10 = vpop.eup %2052 }
  0x9d   :  { %226 = vrot.lane.b32.xlu0 %v2053_v10, %s2216_s2  ;;  %v152_v10 = vrot.slane %v2321_v9, 2 }
  0x9e   :  { %v2055_v12 = vpop.eup %2054 }
  0x9f   :  { %v207_v13 = vadd.f32 1.0, %v2055_v12 }
  0xa1   :  { %2056 = vrcp.f32 %v207_v13  ;;  %v219_v19 = vand.u32 2147483648, %v207_v13  ;;  %vm213_vm3 = vweird.f32 %v207_v13  ;;  %v217_v20 = vand.u32 2147483647, %v207_v13 }
  0xa3   :  { %v220_v22 = vor.u32 1.1754944e-38, %v219_v19  ;;  %vm218_vm5 = vcmp.eq.f32.partialorder %v217_v20, 8.507059e+37 }
  0xa7   :  { %v2057_v14 = vpop.eup %2056 }
  0xa8   :  { %v209_v15 = vmul.f32 %v2057_v14, %v207_v13  ;;  %vm214_vm2 = vweird.f32 %v2057_v14 }
  0xa9   :  { %vm215_vm4 = vmor %vm213_vm3, %vm214_vm2 }
  0xaa   :  { %v210_v16 = vsub.f32 1.0, %v209_v15 }
  0xac   :  { %v211_v17 = vmul.f32 %v2057_v14, %v210_v16 }
  0xae   :  { %v212_v18 = vadd.f32 %v2057_v14, %v211_v17 }
  0xb0   :  { %v216_v21 = vsel %vm215_vm4, %v2057_v14, %v212_v18 }
  0xb1   :  { %v221_v24 = vsel %vm218_vm5, %v220_v22, %v216_v21 }
  0xb2   :  { %v224_v27 = vmul.f32 0.0, %v221_v24 }
 0x10f   :  { %v227_v23 = vpop.permute.xlu0 %226 }
 0x110   :  { %v229_v25 = vmul.f32 %v227_v23, %v221_v24 }
 0x112   :  { %231 = vrot.lane.b32.xlu0 %v229_v25, %s2216_s2 }
 0x184   :  { %v232_v28 = vpop.permute.xlu0 %231 }
 0x185   :  { %v2329_v29 = vadd.f32 %v232_v28, %v224_v27 }
 0x187   :  { %2058 = vtanh.f32 %v2329_v29 }
 0x18d   :  { %v2059_v30 = vpop.eup %2058 }
 0x18e   :  { %237 = vrot.lane.b32.xlu1 %v2059_v30, %s2216_s2 }
 0x200   :  { %v238_v38 = vpop.permute.xlu1 %237 }
 0x201   :  { %v2367_v40 = vmul.f32 %v238_v38, %v221_v24 }
 0x203   :  { %245 = vst [vmem:[#allocation1] ss:$4 sm:$0xff] %v2367_v40 }
 0x20a   :  { %v246_v42 = vld.sshfl [vmem:[#allocation1] sm:$0xff pattern:$0x73625140] }
 0x20b   :  { %275 = vst [vmem:[#allocation1] ss:$4 sm:$0xff] %v2367_v40  ;;  %247 = vrot.lane.b32.xlu0 %v246_v42, %s2217_s29 }
 0x212   :  { %v276_v43 = vld.sshfl [vmem:[#allocation1] sm:$0xff pattern:$0x73625140] }
 0x213   :  { %306 = vst [vmem:[#allocation1] ss:$4 sm:$0xff] %v2367_v40  ;;  %277 = vrot.lane.b32.xlu2 %v276_v43, %s2217_s29 }
 0x21a   :  { %v307_v44 = vld.sshfl [vmem:[#allocation1] sm:$0xff pattern:$0x73625140] }
 0x21b   :  { %308 = vrot.lane.b32.xlu1 %v307_v44, %s2217_s29 }
 0x26d   :  { %v278_v53 = vpop.permute.xlu2 %277 }
 0x26e   :  { %1981 = vmatmul.msk.f32.vlgmr.msrb.gmra.mxu1 %vm249_vm6, %v278_v53 }
 0x26f   :  { %1993 = vmatpush.msk.msrb.mxu1 %vm93_vm0, %v2455_v57 }
 0x27d   :  { %v248_v54 = vpop.permute.xlu0 %247 }
 0x27e   :  { %1980 = vmatmul.msk.f32.vlgmr.msrb.gmra.mxu0 %vm249_vm6, %v248_v54 }
 0x27f   :  { %603 = vmatpush.msrb.mxu0 %v2348_v35 }
 0x281   :  { %604 = vmatpush.msrb.mxu0 %v2353_v36 }
 0x283   :  { %605 = vmatpush.msrb.mxu0 %v2359_v37 }
 0x285   :  { %606 = vmatpush.msrb.mxu0 %v2365_v39 }
 0x28d   :  { %v309_v55 = vpop.permute.xlu1 %308 }
 0x28e   :  { %1982 = vmatmul.msk.f32.vlgmr.msra.gmra.mxu2 %vm249_vm6, %v309_v55 }
 0x2eb   :  { %v298_v60 = vpop.f32.mrf.mxu1 }
 0x2ec   :  { %v299_v61 = vadd.f32 %v2466_v59, %v298_v60 }
 0x2ee   :  { %v301_v62 = vmul.f32 0.5, %v299_v61 }
 0x2f0   :  { %v302_v63 = vmul.f32 1.442695, %v301_v62 }
 0x2f2   :  { %2060 = vpow2.f32 %v302_v63 }
 0x2f8   :  { %v2061_v2 = vpop.eup %2060 }
 0x2f9   :  { %v304_v6 = vmul.f32 %v2061_v2, %v176_v3 }
 0x2fb   :  { %v269_v4 = vpop.f32.mrf.mxu0 }
 0x2fc   :  { %v270_v5 = vadd.f32 %v2474_v1, %v269_v4 }
 0x2fe   :  { %v305_v8 = vadd.f32 %v304_v6, %v270_v5 }
 0x300   :  { %1987 = vmatmul.msk.f32.vlgmr.msra.gmra.mxu1 %vm88_vm1, %v305_v8 }
 0x301   :  { %812 = vmatpush.msra.mxu1 %v2348_v35 }
 0x303   :  { %813 = vmatpush.msra.mxu1 %v2353_v36 }
 0x305   :  { %814 = vmatpush.msra.mxu1 %v2359_v37 }
 0x307   :  { %815 = vmatpush.msra.mxu1 %v2365_v39 }
 0x311   :  { %v329_v11 = vpop.f32.mrf.mxu2 }
 0x312   :  { %v332_v12 = vadd.f32 %v329_v11, %v152_v10 }
 0x314   :  { %2062 = vtanh.f32 %v332_v12  ;;  %v1983_v14 = vmul.f32 -1.442695, %v332_v12 }
 0x316   :  { %2064 = vpow2.f32 %v1983_v14 }
 0x31a   :  { %v2063_v13 = vpop.eup %2062 }
 0x31b   :  { %355 = vrot.lane.b32.xlu2 %v2063_v13, %s2216_s2 }
 0x31c   :  { %v2065_v15 = vpop.eup %2064 }
 0x31d   :  { %v336_v16 = vadd.f32 1.0, %v2065_v15 }
 0x31f   :  { %2066 = vrcp.f32 %v336_v16  ;;  %v348_v22 = vand.u32 2147483648, %v336_v16  ;;  %vm342_vm8 = vweird.f32 %v336_v16  ;;  %v346_v23 = vand.u32 2147483647, %v336_v16 }
 0x321   :  { %v349_v25 = vor.u32 1.1754944e-38, %v348_v22  ;;  %vm347_vm10 = vcmp.eq.f32.partialorder %v346_v23, 8.507059e+37  ;;  %v177_v22 = vld [vmem:[%s3012_s1 + $0x2] sm:$0x3] }
 0x325   :  { %v2067_v17 = vpop.eup %2066 }
 0x326   :  { %v338_v18 = vmul.f32 %v2067_v17, %v336_v16  ;;  %vm343_vm7 = vweird.f32 %v2067_v17 }
 0x327   :  { %vm344_vm9 = vmor %vm342_vm8, %vm343_vm7 }
 0x328   :  { %v339_v19 = vsub.f32 1.0, %v338_v18 }
 0x32a   :  { %v340_v20 = vmul.f32 %v2067_v17, %v339_v19 }
 0x32c   :  { %v341_v21 = vadd.f32 %v2067_v17, %v340_v20 }
 0x32e   :  { %v345_v24 = vsel %vm344_vm9, %v2067_v17, %v341_v21 }
 0x32f   :  { %v350_v27 = vsel %vm347_vm10, %v349_v25, %v345_v24  ;;  %v153_v24 = vrot.slane %v2321_v9, 4 }
 0x330   :  { %v353_v30 = vmul.f32 %v350_v27, %v2329_v29  ;;  %v2503_v29 = vld [vmem:[%s3013_s10] ss:$0 sm:$0xff] }
 0x375   :  { %v356_v26 = vpop.permute.xlu2 %355 }
 0x376   :  { %v358_v28 = vmul.f32 %v356_v26, %v350_v27 }
 0x378   :  { %360 = vrot.lane.b32.xlu1 %v358_v28, %s2216_s2 }
 0x37d   :  { %v454_v43 = vpop.f32.mrf.mxu1 }
 0x37e   :  { %v455_v44 = vadd.f32 %v2503_v29, %v454_v43 }
 0x380   :  { %v1988_v60 = vmul.f32 -1.442695, %v455_v44 }
 0x3ea   :  { %v361_v31 = vpop.permute.xlu1 %360 }
 0x3eb   :  { %v2489_v32 = vadd.f32 %v361_v31, %v353_v30 }
 0x3ed   :  { %2068 = vtanh.f32 %v2489_v32 }
 0x3ee   :  { %2070 = vtanh.f32 %v455_v44 }
 0x3ef   :  { %2072 = vpow2.f32 %v1988_v60 }
 0x3f3   :  { %v2069_v33 = vpop.eup %2068 }
 0x3f4   :  { %366 = vrot.lane.b32.xlu2 %v2069_v33, %s2216_s2  ;;  %v2071_v54 = vpop.eup %2070 }
 0x3f5   :  { %v2073_v61 = vpop.eup %2072 }
 0x3f6   :  { %v460_v62 = vadd.f32 1.0, %v2073_v61 }
 0x3f8   :  { %2074 = vrcp.f32 %v460_v62  ;;  %v472_v10 = vand.u32 2147483648, %v460_v62  ;;  %vm466_vm12 = vweird.f32 %v460_v62  ;;  %v470_v11 = vand.u32 2147483647, %v460_v62 }
 0x3fa   :  { %v473_v13 = vor.u32 1.1754944e-38, %v472_v10  ;;  %vm471_vm14 = vcmp.eq.f32.partialorder %v470_v11, 8.507059e+37 }
 0x3fe   :  { %v2075_v63 = vpop.eup %2074 }
 0x3ff   :  { %v462_v2 = vmul.f32 %v2075_v63, %v460_v62  ;;  %vm467_vm11 = vweird.f32 %v2075_v63 }
 0x400   :  { %vm468_vm13 = vmor %vm466_vm12, %vm467_vm11 }
 0x401   :  { %v463_v4 = vsub.f32 1.0, %v462_v2 }
 0x403   :  { %v464_v5 = vmul.f32 %v2075_v63, %v463_v4 }
 0x405   :  { %v465_v8 = vadd.f32 %v2075_v63, %v464_v5 }
 0x407   :  { %v469_v12 = vsel %vm468_vm13, %v2075_v63, %v465_v8 }
 0x408   :  { %v474_v15 = vsel %vm471_vm14, %v473_v13, %v469_v12  ;;  %v2544_v12 = vld [vmem:[%s3014_s11 + $0x18] sm:$0xff]  ;;  %v2550_v13 = vld [vmem:[%s3014_s11 + $0x10] sm:$0xff] }
 0x409   :  { %v477_v33 = vmul.f32 0.0, %v474_v15  ;;  %657 = vmatpush.msra.mxu2 %v2544_v12 }
 0x40b   :  { %658 = vmatpush.msra.mxu2 %v2550_v13 }
 0x44e   :  { %v367_v34 = vpop.permute.xlu2 %366 }
 0x44f   :  { %v2493_v38 = vmul.f32 %v367_v34, %v350_v27 }
 0x451   :  { %371 = vst [vmem:[#allocation1] ss:$4 sm:$0xff] %v2493_v38 }
 0x458   :  { %v372_v41 = vld.sshfl [vmem:[#allocation1] sm:$0xff pattern:$0x73625140] }
 0x459   :  { %397 = vst [vmem:[#allocation1] ss:$4 sm:$0xff] %v2493_v38  ;;  %373 = vrot.lane.b32.xlu2 %v372_v41, %s2217_s29 }
 0x460   :  { %v398_v42 = vld.sshfl [vmem:[#allocation1] sm:$0xff pattern:$0x73625140] }
 0x461   :  { %494 = vst [vmem:[#allocation1] ss:$4 sm:$0xff] %v2493_v38  ;;  %399 = vrot.lane.b32.xlu1 %v398_v42, %s2217_s29 }
 0x468   :  { %v495_v53 = vld.sshfl [vmem:[#allocation1] sm:$0xff pattern:$0x73625140] }
 0x469   :  { %496 = vrot.lane.b32.xlu0 %v495_v53, %s2217_s29 }
 0x471   :  { %479 = vrot.lane.b32.xlu0 %v2071_v54, %s2216_s2 }
 0x4b3   :  { %v374_v55 = vpop.permute.xlu2 %373 }
 0x4b4   :  { %1984 = vmatmul.msk.f32.vlgmr.msra.gmra.mxu3 %vm249_vm6, %v374_v55 }
 0x4b5   :  { %721 = vmatpush.msra.mxu3 %v2418_v49 }
 0x4b7   :  { %722 = vmatpush.msra.mxu3 %v2423_v50 }
 0x4b9   :  { %723 = vmatpush.msra.mxu3 %v2429_v51 }
 0x4bb   :  { %724 = vmatpush.msra.mxu3 %v2435_v52 }
 0x4d3   :  { %v400_v3 = vpop.permute.xlu1 %399 }
 0x4d4   :  { %1985 = vmatmul.msk.f32.vlgmr.msra.gmra.mxu0 %vm249_vm6, %v400_v3 }
 0x4d5   :  { %786 = vmatpush.msra.mxu0 %v2382_v45 }
 0x4d7   :  { %787 = vmatpush.msra.mxu0 %v2387_v46 }
 0x4d9   :  { %788 = vmatpush.msra.mxu0 %v2394_v47 }
 0x4db   :  { %v497_v6 = vpop.permute.xlu0 %496  ;;  %789 = vmatpush.msra.mxu0 %v2401_v48 }
 0x4dc   :  { %1989 = vmatmul.msk.f32.vlgmr.msrb.gmra.mxu2 %vm249_vm6, %v497_v6 }
 0x4e3   :  { %v480_v14 = vpop.permute.xlu0 %479 }
 0x4e4   :  { %v482_v16 = vmul.f32 %v480_v14, %v474_v15  ;;  %v2555_v14 = vld [vmem:[%s3014_s11 + $0x8] sm:$0xff] }
 0x4e5   :  { %659 = vmatpush.msra.mxu2 %v2555_v14 }
 0x4e6   :  { %484 = vrot.lane.b32.xlu2 %v482_v16, %s2216_s2 }
 0x537   :  { %v394_v21 = vpop.f32.mrf.mxu3 }
 0x538   :  { %v395_v25 = vadd.f32 %v2474_v1, %v394_v21 }
 0x540   :  { %v485_v31 = vpop.permute.xlu2 %484 }
 0x541   :  { %v2528_v34 = vadd.f32 %v485_v31, %v477_v33 }
 0x551   :  { %v420_v17 = vpop.f32.mrf.mxu0 }
 0x552   :  { %v421_v18 = vadd.f32 %v2466_v59, %v420_v17 }
 0x554   :  { %v423_v19 = vmul.f32 0.5, %v421_v18 }
 0x556   :  { %v424_v20 = vmul.f32 1.442695, %v423_v19 }
 0x558   :  { %2076 = vpow2.f32 %v424_v20 }
 0x55e   :  { %v2077_v23 = vpop.eup %2076 }
 0x55f   :  { %v426_v26 = vmul.f32 %v2077_v23, %v177_v22  ;;  %v517_v27 = vpop.f32.mrf.mxu2 }
 0x560   :  { %v520_v28 = vadd.f32 %v517_v27, %v153_v24 }
 0x561   :  { %v427_v30 = vadd.f32 %v426_v26, %v395_v25 }
 0x562   :  { %2078 = vtanh.f32 %v520_v28  ;;  %v1990_v43 = vmul.f32 -1.442695, %v520_v28 }
 0x563   :  { %1994 = vmatmul.msk.f32.vlgmr.msrb.gmra.mxu1 %vm88_vm1, %v427_v30  ;;  %2080 = vtanh.f32 %v2528_v34 }
 0x564   :  { %995 = vmatpush.msrb.mxu1 %v2382_v45  ;;  %2082 = vpow2.f32 %v1990_v43 }
 0x566   :  { %996 = vmatpush.msrb.mxu1 %v2387_v46 }
 0x568   :  { %v2079_v41 = vpop.eup %2078  ;;  %997 = vmatpush.msrb.mxu1 %v2394_v47 }
 0x569   :  { %543 = vrot.lane.b32.xlu1 %v2079_v41, %s2216_s2  ;;  %v2081_v42 = vpop.eup %2080 }
 0x56a   :  { %998 = vmatpush.msrb.mxu1 %v2401_v48  ;;  %v2083_v44 = vpop.eup %2082 }
 0x56b   :  { %v524_v53 = vadd.f32 1.0, %v2083_v44 }
 0x56d   :  { %2084 = vrcp.f32 %v524_v53  ;;  %v536_v63 = vand.u32 2147483648, %v524_v53  ;;  %vm530_vm2 = vweird.f32 %v524_v53  ;;  %v534_v2 = vand.u32 2147483647, %v524_v53 }
 0x56f   :  { %v537_v4 = vor.u32 1.1754944e-38, %v536_v63  ;;  %vm535_vm4 = vcmp.eq.f32.partialorder %v534_v2, 8.507059e+37 }
 0x571   :  { %490 = vrot.lane.b32.xlu1 %v2081_v42, %s2216_s2 }
 0x573   :  { %v2085_v54 = vpop.eup %2084 }
 0x574   :  { %v526_v55 = vmul.f32 %v2085_v54, %v524_v53  ;;  %vm531_vm15 = vweird.f32 %v2085_v54 }
 0x575   :  { %vm532_vm3 = vmor %vm530_vm2, %vm531_vm15 }
 0x576   :  { %v527_v60 = vsub.f32 1.0, %v526_v55 }
 0x578   :  { %v528_v61 = vmul.f32 %v2085_v54, %v527_v60 }
 0x57a   :  { %v529_v62 = vadd.f32 %v2085_v54, %v528_v61 }
 0x57c   :  { %v533_v3 = vsel %vm532_vm3, %v2085_v54, %v529_v62 }
 0x57d   :  { %v538_v6 = vsel %vm535_vm4, %v537_v4, %v533_v3 }
 0x57e   :  { %v541_v16 = vmul.f32 %v538_v6, %v2489_v32 }
 0x5db   :  { %v544_v5 = vpop.permute.xlu1 %543 }
 0x5dc   :  { %v546_v8 = vmul.f32 %v544_v5, %v538_v6 }
 0x5de   :  { %548 = vrot.lane.b32.xlu0 %v546_v8, %s2216_s2 }
 0x5e0   :  { %v636_v25 = vpop.f32.mrf.mxu1 }
 0x5e1   :  { %v637_v26 = vadd.f32 %v2503_v29, %v636_v25 }
 0x5e3   :  { %v491_v10 = vpop.permute.xlu1 %490  ;;  %v639_v27 = vadd.f32 %v637_v26, %v2450_v56 }
 0x5e4   :  { %v2537_v11 = vmul.f32 %v491_v10, %v474_v15  ;;  %v2561_v15 = vld [vmem:[%s3014_s11] sm:$0xff] }
 0x5e5   :  { %660 = vmatpush.msra.mxu2 %v2561_v15 }
 0x5e6   :  { %641 = vrot.lane.b32.xlu0 %v2537_v11, %s2217_s29 }
 0x5e7   :  { %2001 = vmatpush.msk.msrb.mxu2 %vm93_vm0, %v2455_v57 }
 0x650   :  { %v549_v17 = vpop.permute.xlu0 %548 }
 0x651   :  { %v2568_v18 = vadd.f32 %v549_v17, %v541_v16 }
 0x653   :  { %2086 = vtanh.f32 %v2568_v18 }
 0x658   :  { %v642_v19 = vpop.permute.xlu0 %641 }
 0x659   :  { %v2087_v20 = vpop.eup %2086  ;;  %1995 = vmatmul.msk.f32.vlgmr.msra.gmra.mxu2 %vm249_vm6, %v642_v19 }
 0x65a   :  { %554 = vrot.lane.b32.xlu2 %v2087_v20, %s2216_s2  ;;  %1021 = vmatpush.msra.mxu2 %v2348_v35 }
 0x65c   :  { %1022 = vmatpush.msra.mxu2 %v2353_v36 }
 0x65e   :  { %1023 = vmatpush.msra.mxu2 %v2359_v37 }
 0x660   :  { %1024 = vmatpush.msra.mxu2 %v2365_v39 }
 0x6b4   :  { %v555_v32 = vpop.permute.xlu2 %554 }
 0x6b5   :  { %v2577_v21 = vmul.f32 %v555_v32, %v538_v6 }
 0x6b7   :  { %559 = vst [vmem:[#allocation1] ss:$4 sm:$0xff] %v2577_v21 }
 0x6be   :  { %v560_v22 = vld.sshfl [vmem:[#allocation1] sm:$0xff pattern:$0x73625140] }
 0x6bf   :  { %585 = vst [vmem:[#allocation1] ss:$4 sm:$0xff] %v2577_v21  ;;  %561 = vrot.lane.b32.xlu1 %v560_v22, %s2217_s29 }
 0x6c6   :  { %v586_v23 = vld.sshfl [vmem:[#allocation1] sm:$0xff pattern:$0x73625140] }
 0x6c7   :  { %703 = vst [vmem:[#allocation1] ss:$4 sm:$0xff] %v2577_v21  ;;  %587 = vrot.lane.b32.xlu0 %v586_v23, %s2217_s29 }
 0x6ce   :  { %v704_v24 = vld.sshfl [vmem:[#allocation1] sm:$0xff pattern:$0x73625140] }
 0x6cf   :  { %705 = vrot.lane.b32.xlu2 %v704_v24, %s2217_s29  ;;  %v154_v24 = vrot.slane %v2321_v9, 6 }
 0x6dc   :  { %v662_v28 = vpop.f32.mrf.mxu2 }
 0x6dd   :  { %v665_v30 = vadd.f32 %v662_v28, %v639_v27 }
 0x6df   :  { %2088 = vtanh.f32 %v665_v30  ;;  %v1996_v33 = vmul.f32 -1.442695, %v665_v30 }
 0x6e1   :  { %2090 = vpow2.f32 %v1996_v33 }
 0x6e5   :  { %v2089_v31 = vpop.eup %2088 }
 0x6e6   :  { %688 = vrot.lane.b32.xlu1 %v2089_v31, %s2216_s2 }
 0x6e7   :  { %v2091_v42 = vpop.eup %2090 }
 0x6e8   :  { %v669_v43 = vadd.f32 1.0, %v2091_v42 }
 0x6ea   :  { %2092 = vrcp.f32 %v669_v43  ;;  %v681_v63 = vand.u32 2147483648, %v669_v43  ;;  %vm675_vm7 = vweird.f32 %v669_v43  ;;  %v679_v2 = vand.u32 2147483647, %v669_v43 }
 0x6ec   :  { %v682_v4 = vor.u32 1.1754944e-38, %v681_v63  ;;  %vm680_vm9 = vcmp.eq.f32.partialorder %v679_v2, 8.507059e+37 }
 0x6f0   :  { %v2093_v54 = vpop.eup %2092 }
 0x6f1   :  { %v671_v55 = vmul.f32 %v2093_v54, %v669_v43  ;;  %vm676_vm5 = vweird.f32 %v2093_v54 }
 0x6f2   :  { %vm677_vm8 = vmor %vm675_vm7, %vm676_vm5 }
 0x6f3   :  { %v672_v60 = vsub.f32 1.0, %v671_v55 }
 0x6f5   :  { %v673_v61 = vmul.f32 %v2093_v54, %v672_v60 }
 0x6f7   :  { %v674_v62 = vadd.f32 %v2093_v54, %v673_v61 }
 0x6f9   :  { %v678_v3 = vsel %vm677_vm8, %v2093_v54, %v674_v62 }
 0x6fa   :  { %v683_v5 = vsel %vm680_vm9, %v682_v4, %v678_v3 }
 0x6fb   :  { %v686_v10 = vmul.f32 %v683_v5, %v2528_v34  ;;  %v178_v34 = vld [vmem:[%s3012_s1 + $0x4] sm:$0x3] }
 0x729   :  { %v706_v44 = vpop.permute.xlu2 %705 }
 0x731   :  { %v562_v41 = vpop.permute.xlu1 %561 }
 0x732   :  { %1991 = vmatmul.msk.f32.vlgmr.msrb.gmra.mxu3 %vm249_vm6, %v562_v41 }
 0x733   :  { %866 = vmatpush.msrb.mxu3 %v2544_v12 }
 0x735   :  { %867 = vmatpush.msrb.mxu3 %v2550_v13 }
 0x737   :  { %868 = vmatpush.msrb.mxu3 %v2555_v14 }
 0x739   :  { %v588_v53 = vpop.permute.xlu0 %587  ;;  %869 = vmatpush.msrb.mxu3 %v2561_v15 }
 0x73a   :  { %1992 = vmatmul.msk.f32.vlgmr.msrb.gmra.mxu0 %vm249_vm6, %v588_v53  ;;  %1997 = vmatmul.msk.f32.vlgmr.msra.gmra.mxu3 %vm249_vm6, %v706_v44 }
 0x73b   :  { %930 = vmatpush.msrb.mxu0 %v2418_v49  ;;  %2009 = vmatpush.msk.msra.mxu3 %vm93_vm0, %v2455_v57 }
 0x73d   :  { %931 = vmatpush.msrb.mxu0 %v2423_v50 }
 0x73f   :  { %932 = vmatpush.msrb.mxu0 %v2429_v51 }
 0x741   :  { %933 = vmatpush.msrb.mxu0 %v2435_v52 }
 0x758   :  { %v689_v6 = vpop.permute.xlu1 %688 }
 0x759   :  { %v691_v8 = vmul.f32 %v689_v6, %v683_v5 }
 0x75b   :  { %693 = vrot.lane.b32.xlu2 %v691_v8, %s2216_s2 }
 0x7b5   :  { %v582_v16 = vpop.f32.mrf.mxu3  ;;  %v694_v17 = vpop.permute.xlu2 %693 }
 0x7b6   :  { %v2603_v19 = vadd.f32 %v694_v17, %v686_v10  ;;  %v583_v30 = vadd.f32 %v2474_v1, %v582_v16 }
 0x7b7   :  { %v608_v20 = vpop.f32.mrf.mxu0 }
 0x7b8   :  { %2094 = vtanh.f32 %v2603_v19  ;;  %v609_v32 = vadd.f32 %v2466_v59, %v608_v20 }
 0x7ba   :  { %v611_v22 = vmul.f32 0.5, %v609_v32 }
 0x7bc   :  { %v612_v23 = vmul.f32 1.442695, %v611_v22 }
 0x7bd   :  { %v726_v25 = vpop.f32.mrf.mxu3 }
 0x7be   :  { %v2095_v26 = vpop.eup %2094  ;;  %2096 = vpow2.f32 %v612_v23  ;;  %v729_v27 = vadd.f32 %v726_v25, %v154_v24 }
 0x7bf   :  { %699 = vrot.lane.b32.xlu1 %v2095_v26, %s2216_s2 }
 0x7c0   :  { %2098 = vtanh.f32 %v729_v27  ;;  %v1998_v9 = vmul.f32 -1.442695, %v729_v27  ;;  %v166_v27 = vrot.slane %v2450_v56, 2 }
 0x7c2   :  { %2100 = vpow2.f32 %v1998_v9 }
 0x7c4   :  { %v2097_v28 = vpop.eup %2096 }
 0x7c5   :  { %v614_v31 = vmul.f32 %v2097_v28, %v178_v34 }
 0x7c6   :  { %v2099_v33 = vpop.eup %2098 }
 0x7c7   :  { %v615_v41 = vadd.f32 %v614_v31, %v583_v30  ;;  %752 = vrot.lane.b32.xlu0 %v2099_v33, %s2216_s2 }
 0x7c8   :  { %v2101_v42 = vpop.eup %2100 }
 0x7c9   :  { %2002 = vmatmul.msk.f32.vlgmr.msrb.gmra.mxu2 %vm88_vm1, %v615_v41  ;;  %v733_v43 = vadd.f32 1.0, %v2101_v42 }
 0x7ca   :  { %1204 = vmatpush.msrb.mxu2 %v2382_v45 }
 0x7cb   :  { %2102 = vrcp.f32 %v733_v43  ;;  %v745_v63 = vand.u32 2147483648, %v733_v43  ;;  %vm739_vm11 = vweird.f32 %v733_v43  ;;  %v743_v2 = vand.u32 2147483647, %v733_v43 }
 0x7cc   :  { %1205 = vmatpush.msrb.mxu2 %v2387_v46 }
 0x7cd   :  { %v746_v4 = vor.u32 1.1754944e-38, %v745_v63  ;;  %vm744_vm13 = vcmp.eq.f32.partialorder %v743_v2, 8.507059e+37 }
 0x7ce   :  { %1206 = vmatpush.msrb.mxu2 %v2394_v47 }
 0x7d0   :  { %1207 = vmatpush.msrb.mxu2 %v2401_v48 }
 0x7d1   :  { %v2103_v44 = vpop.eup %2102 }
 0x7d2   :  { %v735_v53 = vmul.f32 %v2103_v44, %v733_v43  ;;  %vm740_vm10 = vweird.f32 %v2103_v44 }
 0x7d3   :  { %vm741_vm12 = vmor %vm739_vm11, %vm740_vm10 }
 0x7d4   :  { %v736_v54 = vsub.f32 1.0, %v735_v53 }
 0x7d6   :  { %v737_v55 = vmul.f32 %v2103_v44, %v736_v54 }
 0x7d8   :  { %v738_v62 = vadd.f32 %v2103_v44, %v737_v55 }
 0x7da   :  { %v742_v3 = vsel %vm741_vm12, %v2103_v44, %v738_v62 }
 0x7db   :  { %v747_v8 = vsel %vm744_vm13, %v746_v4, %v742_v3 }
 0x831   :  { %v700_v60 = vpop.permute.xlu1 %699 }
 0x832   :  { %v2619_v61 = vmul.f32 %v700_v60, %v683_v5  ;;  %v750_v5 = vmul.f32 %v747_v8, %v2568_v18 }
 0x834   :  { %850 = vrot.lane.b32.xlu0 %v2619_v61, %s2217_s29 }
 0x839   :  { %v753_v6 = vpop.permute.xlu0 %752 }
 0x83a   :  { %v755_v10 = vmul.f32 %v753_v6, %v747_v8 }
 0x83c   :  { %757 = vrot.lane.b32.xlu2 %v755_v10, %s2216_s2 }
 0x84c   :  { %v845_v24 = vpop.f32.mrf.mxu2 }
 0x84d   :  { %v846_v26 = vadd.f32 %v2503_v29, %v845_v24 }
 0x84f   :  { %v848_v34 = vadd.f32 %v846_v26, %v166_v27 }
 0x896   :  { %v758_v16 = vpop.permute.xlu2 %757 }
 0x897   :  { %v2625_v17 = vadd.f32 %v758_v16, %v750_v5 }
 0x899   :  { %2104 = vtanh.f32 %v2625_v17 }
 0x89f   :  { %v2105_v20 = vpop.eup %2104 }
 0x8a0   :  { %763 = vrot.lane.b32.xlu1 %v2105_v20, %s2216_s2 }
 0x8a6   :  { %v851_v32 = vpop.permute.xlu0 %850 }
 0x8a7   :  { %2003 = vmatmul.msk.f32.vlgmr.msrb.gmra.mxu3 %vm249_vm6, %v851_v32 }
 0x8a8   :  { %1230 = vmatpush.msrb.mxu3 %v2348_v35 }
 0x8aa   :  { %1231 = vmatpush.msrb.mxu3 %v2353_v36 }
 0x8ac   :  { %1232 = vmatpush.msrb.mxu3 %v2359_v37 }
 0x8ae   :  { %1233 = vmatpush.msrb.mxu3 %v2365_v39 }
 0x912   :  { %v764_v18 = vpop.permute.xlu1 %763 }
 0x913   :  { %v2634_v22 = vmul.f32 %v764_v18, %v747_v8 }
 0x915   :  { %768 = vst [vmem:[#allocation1] ss:$4 sm:$0xff] %v2634_v22 }
 0x91c   :  { %v769_v23 = vld.sshfl [vmem:[#allocation1] sm:$0xff pattern:$0x73625140] }
 0x91d   :  { %794 = vst [vmem:[#allocation1] ss:$4 sm:$0xff] %v2634_v22  ;;  %770 = vrot.lane.b32.xlu2 %v769_v23, %s2217_s29 }
 0x924   :  { %v795_v25 = vld.sshfl [vmem:[#allocation1] sm:$0xff pattern:$0x73625140] }
 0x925   :  { %796 = vrot.lane.b32.xlu1 %v795_v25, %s2217_s29  ;;  %912 = vst [vmem:[#allocation1] ss:$4 sm:$0xff] %v2634_v22 }
 0x92a   :  { %v871_v28 = vpop.f32.mrf.mxu3 }
 0x92b   :  { %v874_v30 = vadd.f32 %v871_v28, %v848_v34  ;;  %v2667_v34 = vadd.f32 %v2318_v7, %v2469_v0 }
 0x92c   :  { %v913_v31 = vld.sshfl [vmem:[#allocation1] sm:$0xff pattern:$0x73625140] }
 0x92d   :  { %2106 = vtanh.f32 %v874_v30  ;;  %914 = vrot.lane.b32.xlu0 %v913_v31, %s2217_s29  ;;  %v2004_v41 = vmul.f32 -1.442695, %v874_v30  ;;  %v179_v30 = vld [vmem:[%s3012_s1 + $0x6] sm:$0x3] }
 0x92f   :  { %2108 = vpow2.f32 %v2004_v41 }
 0x933   :  { %v2107_v33 = vpop.eup %2106 }
 0x934   :  { %897 = vrot.lane.b32.xlu2 %v2107_v33, %s2216_s2 }
 0x935   :  { %v2109_v9 = vpop.eup %2108 }
 0x936   :  { %v878_v42 = vadd.f32 1.0, %v2109_v9 }
 0x938   :  { %2110 = vrcp.f32 %v878_v42  ;;  %v890_v62 = vand.u32 2147483648, %v878_v42  ;;  %vm884_vm15 = vweird.f32 %v878_v42  ;;  %v888_v63 = vand.u32 2147483647, %v878_v42 }
 0x93a   :  { %v891_v3 = vor.u32 1.1754944e-38, %v890_v62  ;;  %vm889_vm3 = vcmp.eq.f32.partialorder %v888_v63, 8.507059e+37 }
 0x93e   :  { %v2111_v44 = vpop.eup %2110 }
 0x93f   :  { %v880_v53 = vmul.f32 %v2111_v44, %v878_v42  ;;  %vm885_vm14 = vweird.f32 %v2111_v44 }
 0x940   :  { %vm886_vm2 = vmor %vm884_vm15, %vm885_vm14 }
 0x941   :  { %v881_v54 = vsub.f32 1.0, %v880_v53 }
 0x943   :  { %v882_v55 = vmul.f32 %v2111_v44, %v881_v54 }
 0x945   :  { %v883_v60 = vadd.f32 %v2111_v44, %v882_v55 }
 0x947   :  { %v887_v2 = vsel %vm886_vm2, %v2111_v44, %v883_v60 }
 0x948   :  { %v892_v4 = vsel %vm889_vm3, %v891_v3, %v887_v2 }
 0x949   :  { %v895_v16 = vmul.f32 %v892_v4, %v2603_v19 }
 0x977   :  { %v771_v43 = vpop.permute.xlu2 %770 }
 0x978   :  { %1999 = vmatmul.msk.f32.vlgmr.msra.gmra.mxu0 %vm249_vm6, %v771_v43 }
 0x979   :  { %1075 = vmatpush.msra.mxu0 %v2544_v12 }
 0x97b   :  { %1076 = vmatpush.msra.mxu0 %v2550_v13 }
 0x97d   :  { %1077 = vmatpush.msra.mxu0 %v2555_v14 }
 0x97f   :  { %1078 = vmatpush.msra.mxu0 %v2561_v15 }
 0x98e   :  { %v898_v6 = vpop.permute.xlu2 %897 }
 0x98f   :  { %v900_v8 = vmul.f32 %v898_v6, %v892_v4 }
 0x991   :  { %902 = vrot.lane.b32.xlu0 %v900_v8, %s2216_s2 }
 0x997   :  { %v797_v10 = vpop.permute.xlu1 %796 }
 0x998   :  { %2000 = vmatmul.msk.f32.vlgmr.msra.gmra.mxu1 %vm249_vm6, %v797_v10 }
 0x999   :  { %1139 = vmatpush.msra.mxu1 %v2418_v49 }
 0x99b   :  { %1140 = vmatpush.msra.mxu1 %v2423_v50 }
 0x99d   :  { %1141 = vmatpush.msra.mxu1 %v2429_v51 }
 0x99f   :  { %v915_v5 = vpop.permute.xlu0 %914  ;;  %1142 = vmatpush.msra.mxu1 %v2435_v52 }
 0x9a0   :  { %2005 = vmatmul.msk.f32.vlgmr.msrb.gmra.mxu0 %vm249_vm6, %v915_v5 }
 0x9a1   :  { %2017 = vmatpush.msk.msrb.mxu0 %vm93_vm0, %v2455_v57 }
 0x9f5   :  { %v791_v23 = vpop.f32.mrf.mxu0 }
 0x9f6   :  { %v792_v33 = vadd.f32 %v2474_v1, %v791_v23 }
 0xa03   :  { %v903_v20 = vpop.permute.xlu0 %902 }
 0xa04   :  { %v2660_v32 = vadd.f32 %v903_v20, %v895_v16 }
 0xa06   :  { %2112 = vtanh.f32 %v2660_v32 }
 0xa0c   :  { %v2113_v18 = vpop.eup %2112 }
 0xa0d   :  { %908 = vrot.lane.b32.xlu2 %v2113_v18, %s2216_s2 }
 0xa15   :  { %v817_v24 = vpop.f32.mrf.mxu1 }
 0xa16   :  { %v818_v25 = vadd.f32 %v2466_v59, %v817_v24 }
 0xa18   :  { %v820_v26 = vmul.f32 0.5, %v818_v25 }
 0xa1a   :  { %v821_v27 = vmul.f32 1.442695, %v820_v26 }
 0xa1c   :  { %2114 = vpow2.f32 %v821_v27 }
 0xa1d   :  { %v935_v19 = vpop.f32.mrf.mxu0 }
 0xa1e   :  { %v938_v28 = vadd.f32 %v935_v19, %v2667_v34 }
 0xa20   :  { %2116 = vtanh.f32 %v938_v28  ;;  %v2006_v43 = vmul.f32 -1.442695, %v938_v28 }
 0xa22   :  { %v2115_v31 = vpop.eup %2114  ;;  %2118 = vpow2.f32 %v2006_v43 }
 0xa23   :  { %v823_v41 = vmul.f32 %v2115_v31, %v179_v30 }
 0xa25   :  { %v824_v9 = vadd.f32 %v823_v41, %v792_v33 }
 0xa26   :  { %v2117_v42 = vpop.eup %2116 }
 0xa27   :  { %2010 = vmatmul.msk.f32.vlgmr.msra.gmra.mxu3 %vm88_vm1, %v824_v9  ;;  %961 = vrot.lane.b32.xlu1 %v2117_v42, %s2216_s2 }
 0xa28   :  { %1413 = vmatpush.msra.mxu3 %v2382_v45  ;;  %v2119_v44 = vpop.eup %2118 }
 0xa29   :  { %v942_v53 = vadd.f32 1.0, %v2119_v44 }
 0xa2a   :  { %1414 = vmatpush.msra.mxu3 %v2387_v46 }
 0xa2b   :  { %2120 = vrcp.f32 %v942_v53  ;;  %vm948_vm5 = vweird.f32 %v942_v53 }
 0xa2c   :  { %1415 = vmatpush.msra.mxu3 %v2394_v47  ;;  %v954_v47 = vand.u32 2147483648, %v942_v53 }
 0xa2e   :  { %1416 = vmatpush.msra.mxu3 %v2401_v48  ;;  %v952_v48 = vand.u32 2147483647, %v942_v53  ;;  %v955_v63 = vor.u32 1.1754944e-38, %v954_v47 }
 0xa30   :  { %vm953_vm8 = vcmp.eq.f32.partialorder %v952_v48, 8.507059e+37 }
 0xa31   :  { %v2121_v54 = vpop.eup %2120 }
 0xa32   :  { %v944_v55 = vmul.f32 %v2121_v54, %v942_v53  ;;  %vm949_vm4 = vweird.f32 %v2121_v54 }
 0xa33   :  { %vm950_vm7 = vmor %vm948_vm5, %vm949_vm4 }
 0xa34   :  { %v945_v45 = vsub.f32 1.0, %v944_v55 }
 0xa36   :  { %v946_v60 = vmul.f32 %v2121_v54, %v945_v45 }
 0xa38   :  { %v947_v46 = vadd.f32 %v2121_v54, %v946_v60 }
 0xa3a   :  { %v951_v62 = vsel %vm950_vm7, %v2121_v54, %v947_v46 }
 0xa3b   :  { %v956_v3 = vsel %vm953_vm8, %v955_v63, %v951_v62 }
 0xa3c   :  { %v959_v8 = vmul.f32 %v956_v3, %v2625_v17 }
 0xa67   :  { %v909_v7 = vpop.permute.xlu2 %908 }
 0xa68   :  { %v2680_v0 = vmul.f32 %v909_v7, %v892_v4 }
 0xa6a   :  { %1059 = vrot.lane.b32.xlu1 %v2680_v0, %s2217_s29 }
 0xa99   :  { %v962_v2 = vpop.permute.xlu1 %961 }
 0xa9a   :  { %v964_v4 = vmul.f32 %v962_v2, %v956_v3  ;;  %v180_v2 = vld [vmem:[%s3012_s1 + $0x8] sm:$0x3] }
 0xa9c   :  { %966 = vrot.lane.b32.xlu0 %v964_v4, %s2216_s2 }
 0xaaa   :  { %v1054_v20 = vpop.f32.mrf.mxu3 }
 0xadc   :  { %v1060_v6 = vpop.permute.xlu1 %1059 }
 0xadd   :  { %2011 = vmatmul.msk.f32.vlgmr.msra.gmra.mxu0 %vm249_vm6, %v1060_v6 }
 0xade   :  { %1439 = vmatpush.msra.mxu0 %v2348_v35  ;;  %v1055_v35 = vadd.f32 %v2503_v29, %v1054_v20  ;;  %v2199_v20 = vld [vmem:[%s3008_s5] sm:$0xff] }
 0xae0   :  { %1440 = vmatpush.msra.mxu0 %v2353_v36  ;;  %v167_v36 = vrot.slane %v2450_v56, 4 }
 0xae2   :  { %1441 = vmatpush.msra.mxu0 %v2359_v37 }
 0xae4   :  { %1442 = vmatpush.msra.mxu0 %v2365_v39  ;;  %v1057_v39 = vadd.f32 %v1055_v35, %v167_v36 }
 0xb0e   :  { %v967_v10 = vpop.permute.xlu0 %966 }
 0xb0f   :  { %v2691_v5 = vadd.f32 %v967_v10, %v959_v8  ;;  %v2197_v10 = vld [vmem:[%s3008_s5 + $0x10] sm:$0xff] }
 0xb11   :  { %2122 = vtanh.f32 %v2691_v5 }
 0xb17   :  { %v2123_v16 = vpop.eup %2122 }
 0xb18   :  { %972 = vrot.lane.b32.xlu2 %v2123_v16, %s2216_s2  ;;  %v155_v16 = vrot.slane %v2667_v34, 2 }
 0xb5a   :  { %v1080_v37 = vpop.f32.mrf.mxu0 }
 0xb5b   :  { %v1083_v17 = vadd.f32 %v1080_v37, %v1057_v39 }
 0xb5d   :  { %2124 = vtanh.f32 %v1083_v17  ;;  %v2012_v19 = vmul.f32 -1.442695, %v1083_v17 }
 0xb5f   :  { %2126 = vpow2.f32 %v2012_v19 }
 0xb63   :  { %v2125_v25 = vpop.eup %2124 }
 0xb65   :  { %v2127_v28 = vpop.eup %2126 }
 0xb66   :  { %v1087_v30 = vadd.f32 1.0, %v2127_v28 }
 0xb68   :  { %2128 = vrcp.f32 %v1087_v30  ;;  %v1099_v44 = vand.u32 2147483648, %v1087_v30  ;;  %vm1093_vm10 = vweird.f32 %v1087_v30  ;;  %v1097_v53 = vand.u32 2147483647, %v1087_v30 }
 0xb6a   :  { %vm1098_vm12 = vcmp.eq.f32.partialorder %v1097_v53, 8.507059e+37  ;;  %v2200_v53 = vld [vmem:[%s3006_s7 + $0x18] sm:$0xff] }
 0xb6e   :  { %v2129_v33 = vpop.eup %2128 }
 0xb6f   :  { %v1089_v41 = vmul.f32 %v2129_v33, %v1087_v30  ;;  %vm1094_vm9 = vweird.f32 %v2129_v33 }
 0xb70   :  { %vm1095_vm11 = vmor %vm1093_vm10, %vm1094_vm9 }
 0xb71   :  { %v1090_v9 = vsub.f32 1.0, %v1089_v41 }
 0xb72   :  { %v973_v18 = vpop.permute.xlu2 %972 }
 0xb73   :  { %v2695_v23 = vmul.f32 %v973_v18, %v956_v3  ;;  %v1091_v42 = vmul.f32 %v2129_v33, %v1090_v9 }
 0xb75   :  { %977 = vst [vmem:[#allocation1] ss:$4 sm:$0xff] %v2695_v23  ;;  %v1092_v43 = vadd.f32 %v2129_v33, %v1091_v42 }
 0xb7c   :  { %v978_v24 = vld.sshfl [vmem:[#allocation1] sm:$0xff pattern:$0x73625140] }
 0xb7d   :  { %979 = vrot.lane.b32.xlu0 %v978_v24, %s2217_s29  ;;  %1003 = vst [vmem:[#allocation1] ss:$4 sm:$0xff] %v2695_v23 }
 0xb84   :  { %v1004_v26 = vld.sshfl [vmem:[#allocation1] sm:$0xff pattern:$0x73625140] }
 0xb85   :  { %1106 = vrot.lane.b32.xlu0 %v2125_v25, %s2216_s2  ;;  %1005 = vrot.lane.b32.xlu2 %v1004_v26, %s2217_s29  ;;  %1121 = vst [vmem:[#allocation1] ss:$4 sm:$0xff] %v2695_v23 }
 0xb8c   :  { %v1122_v27 = vld.sshfl [vmem:[#allocation1] sm:$0xff pattern:$0x73625140] }
 0xb8d   :  { %1123 = vrot.lane.b32.xlu1 %v1122_v27, %s2217_s29 }
 0xbdf   :  { %v1006_v31 = vpop.permute.xlu2 %1005 }
 0xbe0   :  { %2008 = vmatmul.msk.f32.vlgmr.msra.gmra.mxu2 %vm249_vm6, %v1006_v31 }
 0xbe1   :  { %1348 = vmatpush.msra.mxu2 %v2418_v49  ;;  %v1096_v49 = vsel %vm1095_vm11, %v2129_v33, %v1092_v43 }
 0xbe3   :  { %1349 = vmatpush.msra.mxu2 %v2423_v50  ;;  %v1100_v50 = vor.u32 1.1754944e-38, %v1099_v44 }
 0xbe5   :  { %1350 = vmatpush.msra.mxu2 %v2429_v51  ;;  %v1101_v51 = vsel %vm1098_vm12, %v1100_v50, %v1096_v49  ;;  %v2201_v49 = vld [vmem:[%s3006_s7 + $0x10] sm:$0xff]  ;;  %v2202_v50 = vld [vmem:[%s3006_s7 + $0x8] sm:$0xff] }
 0xbe6   :  { %v1104_v48 = vmul.f32 %v1101_v51, %v2660_v32  ;;  %v2196_v32 = vld [vmem:[%s3008_s5 + $0x18] sm:$0xff] }
 0xbe7   :  { %1351 = vmatpush.msra.mxu2 %v2435_v52 }
 0xbef   :  { %v980_v7 = vpop.permute.xlu0 %979 }
 0xbf0   :  { %2007 = vmatmul.msk.f32.vlgmr.msrb.gmra.mxu1 %vm249_vm6, %v980_v7 }
 0xbf1   :  { %1284 = vmatpush.msrb.mxu1 %v2544_v12 }
 0xbf3   :  { %1285 = vmatpush.msrb.mxu1 %v2550_v13 }
 0xbf5   :  { %1286 = vmatpush.msrb.mxu1 %v2555_v14 }
 0xbf7   :  { %v1107_v52 = vpop.permute.xlu0 %1106  ;;  %1287 = vmatpush.msrb.mxu1 %v2561_v15 }
 0xbf8   :  { %v1109_v54 = vmul.f32 %v1107_v52, %v1101_v51 }
 0xbfa   :  { %1111 = vrot.lane.b32.xlu1 %v1109_v54, %s2216_s2 }
 0xbff   :  { %v1124_v55 = vpop.permute.xlu1 %1123 }
 0xc00   :  { %2013 = vmatmul.msk.f32.vlgmr.msra.gmra.mxu1 %vm249_vm6, %v1124_v55 }
 0xc01   :  { %2025 = vmatpush.msk.msra.mxu1 %vm93_vm0, %v2455_v57 }
 0xc63   :  { %v1026_v45 = vpop.f32.mrf.mxu2 }
 0xc64   :  { %v1027_v60 = vadd.f32 %v2466_v59, %v1026_v45 }
 0xc66   :  { %v1029_v46 = vmul.f32 0.5, %v1027_v60 }
 0xc68   :  { %v1030_v47 = vmul.f32 1.442695, %v1029_v46 }
 0xc6a   :  { %2130 = vpow2.f32 %v1030_v47 }
 0xc6c   :  { %v1112_v62 = vpop.permute.xlu1 %1111 }
 0xc6d   :  { %v2722_v63 = vadd.f32 %v1112_v62, %v1104_v48  ;;  %v1000_v3 = vpop.f32.mrf.mxu1  ;;  %v168_v62 = vrot.slane %v2450_v56, 6 }
 0xc6e   :  { %v1001_v57 = vadd.f32 %v2474_v1, %v1000_v3  ;;  %v2198_v1 = vld [vmem:[%s3008_s5 + $0x8] sm:$0xff] }
 0xc6f   :  { %2132 = vtanh.f32 %v2722_v63 }
 0xc70   :  { %v2131_v4 = vpop.eup %2130 }
 0xc71   :  { %v1032_v6 = vmul.f32 %v2131_v4, %v180_v2 }
 0xc73   :  { %v1033_v59 = vadd.f32 %v1032_v6, %v1001_v57 }
 0xc75   :  { %v2133_v8 = vpop.eup %2132  ;;  %2018 = vmatmul.msk.f32.vlgmr.msrb.gmra.mxu0 %vm88_vm1, %v1033_v59 }
 0xc76   :  { %1117 = vrot.lane.b32.xlu2 %v2133_v8, %s2216_s2  ;;  %1622 = vmatpush.msrb.mxu0 %v2196_v32 }
 0xc78   :  { %1623 = vmatpush.msrb.mxu0 %v2197_v10 }
 0xc7a   :  { %1624 = vmatpush.msrb.mxu0 %v2198_v1 }
 0xc7c   :  { %1625 = vmatpush.msrb.mxu0 %v2199_v20 }
 0xc7d   :  { %v1144_v18 = vpop.f32.mrf.mxu1 }
 0xc7e   :  { %v1147_v35 = vadd.f32 %v1144_v18, %v155_v16 }
 0xc80   :  { %2134 = vtanh.f32 %v1147_v35  ;;  %v2014_v37 = vmul.f32 -1.442695, %v1147_v35 }
 0xc82   :  { %2136 = vpow2.f32 %v2014_v37 }
 0xc86   :  { %v2135_v36 = vpop.eup %2134 }
 0xc87   :  { %1170 = vrot.lane.b32.xlu0 %v2135_v36, %s2216_s2 }
 0xc88   :  { %v2137_v24 = vpop.eup %2136 }
 0xc89   :  { %v1151_v25 = vadd.f32 1.0, %v2137_v24 }
 0xc8b   :  { %2138 = vrcp.f32 %v1151_v25  ;;  %v1163_v31 = vand.u32 2147483648, %v1151_v25  ;;  %vm1157_vm14 = vweird.f32 %v1151_v25  ;;  %v1161_v33 = vand.u32 2147483647, %v1151_v25 }
 0xc8d   :  { %v1164_v9 = vor.u32 1.1754944e-38, %v1163_v31  ;;  %vm1162_vm2 = vcmp.eq.f32.partialorder %v1161_v33, 8.507059e+37  ;;  %v2206_v31 = vld [vmem:[%s3009_s4 + $0x10] sm:$0xff]  ;;  %v2207_v33 = vld [vmem:[%s3009_s4 + $0x8] sm:$0xff] }
 0xc91   :  { %v2139_v26 = vpop.eup %2138 }
 0xc92   :  { %v1153_v27 = vmul.f32 %v2139_v26, %v1151_v25  ;;  %vm1158_vm13 = vweird.f32 %v2139_v26 }
 0xc93   :  { %vm1159_vm15 = vmor %vm1157_vm14, %vm1158_vm13 }
 0xc94   :  { %v1154_v19 = vsub.f32 1.0, %v1153_v27 }
 0xc96   :  { %v1155_v28 = vmul.f32 %v2139_v26, %v1154_v19 }
 0xc98   :  { %v1156_v30 = vadd.f32 %v2139_v26, %v1155_v28  ;;  %v2204_v28 = vld [vmem:[%s3009_s4 + $0x18] sm:$0xff] }
 0xc9a   :  { %v1160_v41 = vsel %vm1159_vm15, %v2139_v26, %v1156_v30  ;;  %v2792_v30 = vld [vmem:[%s3011_s9] sm:$0xf] }
 0xc9b   :  { %v1165_v7 = vsel %vm1162_vm2, %v1164_v9, %v1160_v41  ;;  %v2208_v41 = vld [vmem:[%s3009_s4] sm:$0xff] }
 0xc9c   :  { %v1168_v52 = vmul.f32 %v1165_v7, %v2691_v5 }
 0xcd0   :  { %v1118_v39 = vpop.permute.xlu2 %1117 }
 0xcd1   :  { %v2745_v17 = vmul.f32 %v1118_v39, %v1101_v51  ;;  %v2203_v51 = vld [vmem:[%s3006_s7] sm:$0xff] }
 0xcd3   :  { %1268 = vrot.lane.b32.xlu1 %v2745_v17, %s2217_s29 }
 0xcf2   :  { %v1263_v60 = vpop.f32.mrf.mxu0 }
 0xcf3   :  { %v1264_v48 = vadd.f32 %v2503_v29, %v1263_v60 }
 0xcf5   :  { %v1266_v5 = vadd.f32 %v1264_v48, %v168_v62  ;;  %v2825_v62 = vld [vmem:[%s3010_s6] ss:$0 sm:$0xff] }
 0xcf9   :  { %v1171_v42 = vpop.permute.xlu0 %1170 }
 0xcfa   :  { %v1173_v43 = vmul.f32 %v1171_v42, %v1165_v7 }
 0xcfc   :  { %1175 = vrot.lane.b32.xlu2 %v1173_v43, %s2216_s2 }
 0xd45   :  { %v1269_v44 = vpop.permute.xlu1 %1268 }
 0xd46   :  { %2019 = vmatmul.msk.f32.vlgmr.msrb.gmra.mxu1 %vm249_vm6, %v1269_v44 }
 0xd47   :  { %1648 = vmatpush.msrb.mxu1 %v2200_v53  ;;  %v156_v53 = vrot.slane %v2667_v34, 4 }
 0xd49   :  { %1649 = vmatpush.msrb.mxu1 %v2201_v49 }
 0xd4b   :  { %1650 = vmatpush.msrb.mxu1 %v2202_v50 }
 0xd4d   :  { %1651 = vmatpush.msrb.mxu1 %v2203_v51  ;;  %v2815_v51 = vld [vmem:[%s3007_s8] ss:$0 sm:$0xff] }
 0xd56   :  { %v1176_v54 = vpop.permute.xlu2 %1175 }
 0xd57   :  { %v2764_v55 = vadd.f32 %v1176_v54, %v1168_v52 }
 0xd59   :  { %2140 = vtanh.f32 %v2764_v55 }
 0xd5f   :  { %v2141_v45 = vpop.eup %2140 }
 0xd60   :  { %1181 = vrot.lane.b32.xlu0 %v2141_v45, %s2216_s2 }
 0xdc3   :  { %v1289_v2 = vpop.f32.mrf.mxu1 }
 0xdc4   :  { %v1292_v3 = vadd.f32 %v1289_v2, %v1266_v5 }
 0xdc6   :  { %2142 = vtanh.f32 %v1292_v3  ;;  %v2020_v56 = vmul.f32 -1.442695, %v1292_v3 }
 0xdc8   :  { %2144 = vpow2.f32 %v2020_v56 }
 0xdcc   :  { %v2143_v57 = vpop.eup %2142 }
 0xdce   :  { %v2145_v59 = vpop.eup %2144 }
 0xdcf   :  { %v1296_v8 = vadd.f32 1.0, %v2145_v59 }
 0xdd1   :  { %2146 = vrcp.f32 %v1296_v8  ;;  %v1308_v35 = vand.u32 2147483648, %v1296_v8  ;;  %vm1302_vm4 = vweird.f32 %v1296_v8  ;;  %v1306_v36 = vand.u32 2147483647, %v1296_v8 }
 0xdd2   :  { %v1182_v46 = vpop.permute.xlu0 %1181 }
 0xdd3   :  { %v2768_v47 = vmul.f32 %v1182_v46, %v1165_v7  ;;  %v1309_v39 = vor.u32 1.1754944e-38, %v1308_v35  ;;  %vm1307_vm7 = vcmp.eq.f32.partialorder %v1306_v36, 8.507059e+37  ;;  %v181_v46 = vld [vmem:[%s3012_s1 + $0xa] sm:$0x3] }
 0xdd5   :  { %1186 = vst [vmem:[#allocation1] ss:$4 sm:$0xff] %v2768_v47 }
 0xdd7   :  { %v2147_v32 = vpop.eup %2146 }
 0xdd8   :  { %v1298_v10 = vmul.f32 %v2147_v32, %v1296_v8  ;;  %vm1303_vm3 = vweird.f32 %v2147_v32 }
 0xdd9   :  { %vm1304_vm5 = vmor %vm1302_vm4, %vm1303_vm3 }
 0xdda   :  { %v1299_v1 = vsub.f32 1.0, %v1298_v10 }
 0xddc   :  { %v1187_v4 = vld.sshfl [vmem:[#allocation1] sm:$0xff pattern:$0x73625140]  ;;  %v1300_v16 = vmul.f32 %v2147_v32, %v1299_v1 }
 0xddd   :  { %1188 = vrot.lane.b32.xlu1 %v1187_v4, %s2217_s29  ;;  %1212 = vst [vmem:[#allocation1] ss:$4 sm:$0xff] %v2768_v47 }
 0xdde   :  { %v1301_v18 = vadd.f32 %v2147_v32, %v1300_v16 }
 0xde0   :  { %v1305_v37 = vsel %vm1304_vm5, %v2147_v32, %v1301_v18 }
 0xde1   :  { %v1310_v25 = vsel %vm1307_vm7, %v1309_v39, %v1305_v37 }
 0xde2   :  { %v1313_v9 = vmul.f32 %v1310_v25, %v2722_v63 }
 0xde4   :  { %v1213_v6 = vld.sshfl [vmem:[#allocation1] sm:$0xff pattern:$0x73625140] }
 0xde5   :  { %1315 = vrot.lane.b32.xlu1 %v2143_v57, %s2216_s2  ;;  %1214 = vrot.lane.b32.xlu0 %v1213_v6, %s2217_s29  ;;  %1330 = vst [vmem:[#allocation1] ss:$4 sm:$0xff] %v2768_v47 }
 0xdec   :  { %v1331_v29 = vld.sshfl [vmem:[#allocation1] sm:$0xff pattern:$0x73625140] }
 0xded   :  { %1332 = vrot.lane.b32.xlu2 %v1331_v29, %s2217_s29 }
 0xe47   :  { %v1333_v24 = vpop.permute.xlu2 %1332 }
 0xe4f   :  { %v1189_v20 = vpop.permute.xlu1 %1188 }
 0xe50   :  { %2015 = vmatmul.msk.f32.vlgmr.msrb.gmra.mxu2 %vm249_vm6, %v1189_v20 }
 0xe51   :  { %1493 = vmatpush.msrb.mxu2 %v2544_v12 }
 0xe53   :  { %1494 = vmatpush.msrb.mxu2 %v2550_v13 }
 0xe55   :  { %1495 = vmatpush.msrb.mxu2 %v2555_v14 }
 0xe57   :  { %v1316_v26 = vpop.permute.xlu1 %1315  ;;  %v1215_v27 = vpop.permute.xlu0 %1214  ;;  %1496 = vmatpush.msrb.mxu2 %v2561_v15 }
 0xe58   :  { %v1318_v19 = vmul.f32 %v1316_v26, %v1310_v25  ;;  %2016 = vmatmul.msk.f32.vlgmr.msrb.gmra.mxu3 %vm249_vm6, %v1215_v27  ;;  %2021 = vmatmul.msk.f32.vlgmr.msra.gmra.mxu2 %vm249_vm6, %v1333_v24 }
 0xe59   :  { %1557 = vmatpush.msrb.mxu3 %v2204_v28  ;;  %2033 = vmatpush.msk.msra.mxu2 %vm93_vm0, %v2792_v30 }
 0xe5a   :  { %1320 = vrot.lane.b32.xlu2 %v1318_v19, %s2216_s2  ;;  %v2846_v19 = vld [vmem:[%s3013_s10] ss:$0 sm:$0xff] }
 0xe5b   :  { %1558 = vmatpush.msrb.mxu3 %v2206_v31 }
 0xe5d   :  { %1559 = vmatpush.msrb.mxu3 %v2207_v33 }
 0xe5f   :  { %1560 = vmatpush.msrb.mxu3 %v2208_v41 }
 0xeb4   :  { %v1321_v42 = vpop.permute.xlu2 %1320 }
 0xeb5   :  { %v2807_v7 = vadd.f32 %v1321_v42, %v1313_v9 }
 0xeb7   :  { %2148 = vtanh.f32 %v2807_v7 }
 0xebd   :  { %v2149_v43 = vpop.eup %2148 }
 0xebe   :  { %1326 = vrot.lane.b32.xlu0 %v2149_v43, %s2216_s2 }
 0xed3   :  { %v1209_v44 = vpop.f32.mrf.mxu2 }
 0xed4   :  { %v1210_v2 = vadd.f32 %v2825_v62, %v1209_v44 }
 0xedb   :  { %v1235_v49 = vpop.f32.mrf.mxu3  ;;  %v1353_v50 = vpop.f32.mrf.mxu2 }
 0xedc   :  { %v1236_v63 = vadd.f32 %v2815_v51, %v1235_v49  ;;  %v1356_v52 = vadd.f32 %v1353_v50, %v156_v53 }
 0xede   :  { %v1238_v54 = vmul.f32 0.5, %v1236_v63  ;;  %2150 = vtanh.f32 %v1356_v52  ;;  %v2022_v4 = vmul.f32 -1.442695, %v1356_v52 }
 0xee0   :  { %v1239_v45 = vmul.f32 1.442695, %v1238_v54 }
 0xee2   :  { %2152 = vpow2.f32 %v1239_v45 }
 0xee3   :  { %2154 = vpow2.f32 %v2022_v4 }
 0xee4   :  { %v2151_v60 = vpop.eup %2150 }
 0xee5   :  { %1379 = vrot.lane.b32.xlu1 %v2151_v60, %s2216_s2 }
 0xee8   :  { %v2153_v48 = vpop.eup %2152 }
 0xee9   :  { %v1241_v5 = vmul.f32 %v2153_v48, %v181_v46  ;;  %v2155_v29 = vpop.eup %2154  ;;  %v2212_v48 = vld [vmem:[%s3014_s11 + $0x18] sm:$0xff] }
 0xeea   :  { %v1360_v56 = vadd.f32 1.0, %v2155_v29 }
 0xeeb   :  { %v1242_v3 = vadd.f32 %v1241_v5, %v1210_v2  ;;  %v2213_v5 = vld [vmem:[%s3014_s11 + $0x10] sm:$0xff] }
 0xeec   :  { %2156 = vrcp.f32 %v1360_v56  ;;  %vm1366_vm9 = vweird.f32 %v1360_v56 }
 0xeed   :  { %2026 = vmatmul.msk.f32.vlgmr.msra.gmra.mxu1 %vm88_vm1, %v1242_v3 }
 0xeee   :  { %1789 = vmatpush.msra.mxu1 %v2544_v12 }
 0xef0   :  { %1790 = vmatpush.msra.mxu1 %v2550_v13  ;;  %v1372_v13 = vand.u32 2147483648, %v1360_v56 }
 0xef2   :  { %1791 = vmatpush.msra.mxu1 %v2555_v14  ;;  %v2157_v59 = vpop.eup %2156  ;;  %v1370_v14 = vand.u32 2147483647, %v1360_v56  ;;  %v1373_v1 = vor.u32 1.1754944e-38, %v1372_v13 }
 0xef3   :  { %v1362_v8 = vmul.f32 %v2157_v59, %v1360_v56  ;;  %vm1367_vm8 = vweird.f32 %v2157_v59  ;;  %v2215_v56 = vld [vmem:[%s3014_s11] sm:$0xff] }
 0xef4   :  { %1792 = vmatpush.msra.mxu1 %v2561_v15  ;;  %vm1368_vm10 = vmor %vm1366_vm9, %vm1367_vm8  ;;  %vm1371_vm11 = vcmp.eq.f32.partialorder %v1370_v14, 8.507059e+37 }
 0xef5   :  { %v1363_v32 = vsub.f32 1.0, %v1362_v8 }
 0xef7   :  { %v1364_v12 = vmul.f32 %v2157_v59, %v1363_v32 }
 0xef9   :  { %v1365_v10 = vadd.f32 %v2157_v59, %v1364_v12 }
 0xefb   :  { %v1369_v15 = vsel %vm1368_vm10, %v2157_v59, %v1365_v10 }
 0xefc   :  { %v1374_v20 = vsel %vm1371_vm11, %v1373_v1, %v1369_v15 }
 0xefd   :  { %v1377_v36 = vmul.f32 %v1374_v20, %v2764_v55 }
 0xf30   :  { %v1327_v57 = vpop.permute.xlu0 %1326 }
 0xf31   :  { %v1329_v6 = vmul.f32 %v1327_v57, %v1310_v25  ;;  %v2214_v57 = vld [vmem:[%s3014_s11 + $0x8] sm:$0xff] }
 0xf33   :  { %1852 = vst [vmem:[#allocation1 + $0x20] ss:$4 sm:$0xff] %v1329_v6  ;;  %1477 = vrot.lane.b32.xlu2 %v1329_v6, %s2217_s29 }
 0xf57   :  { %v1380_v16 = vpop.permute.xlu1 %1379 }
 0xf58   :  { %v1382_v18 = vmul.f32 %v1380_v16, %v1374_v20 }
 0xf5a   :  { %1384 = vrot.lane.b32.xlu0 %v1382_v18, %s2216_s2 }
 0xf6a   :  { %v1472_v25 = vpop.f32.mrf.mxu1 }
 0xf6b   :  { %v1473_v28 = vadd.f32 %v2846_v19, %v1472_v25 }
 0xf6d   :  { %v1475_v31 = vadd.f32 %v1473_v28, %v2461_v58 }
 0xf8d   :  { %v1478_v35 = vpop.permute.xlu2 %1477 }
 0xf8e   :  { %2027 = vmatmul.msk.f32.vlgmr.msrb.gmra.mxu2 %vm249_vm6, %v1478_v35  ;;  %v157_v35 = vrot.slane %v2667_v34, 6 }
 0xfcc   :  { %v1385_v37 = vpop.permute.xlu0 %1384 }
 0xfcd   :  { %v2837_v39 = vadd.f32 %v1385_v37, %v1377_v36 }
 0xfcf   :  { %2158 = vtanh.f32 %v2837_v39 }
 0xfd5   :  { %v2159_v24 = vpop.eup %2158 }
 0xfd6   :  { %1390 = vrot.lane.b32.xlu1 %v2159_v24, %s2216_s2 }
0x1011   :  { %v1498_v55 = vpop.f32.mrf.mxu2 }
0x1012   :  { %v1501_v33 = vadd.f32 %v1498_v55, %v1475_v31 }
0x1014   :  { %2160 = vtanh.f32 %v1501_v33  ;;  %v2028_v44 = vmul.f32 -1.442695, %v1501_v33 }
0x1016   :  { %2162 = vpow2.f32 %v2028_v44 }
0x101a   :  { %v2161_v9 = vpop.eup %2160 }
0x101c   :  { %v2163_v53 = vpop.eup %2162 }
0x101d   :  { %v1505_v49 = vadd.f32 1.0, %v2163_v53 }
0x101f   :  { %2164 = vrcp.f32 %v1505_v49  ;;  %v1517_v46 = vand.u32 2147483648, %v1505_v49  ;;  %vm1511_vm13 = vweird.f32 %v1505_v49  ;;  %v1515_v2 = vand.u32 2147483647, %v1505_v49 }
0x1021   :  { %v1518_v4 = vor.u32 1.1754944e-38, %v1517_v46  ;;  %vm1516_vm15 = vcmp.eq.f32.partialorder %v1515_v2, 8.507059e+37 }
0x1025   :  { %v2165_v50 = vpop.eup %2164 }
0x1026   :  { %v1507_v63 = vmul.f32 %v2165_v50, %v1505_v49  ;;  %vm1512_vm12 = vweird.f32 %v2165_v50 }
0x1027   :  { %vm1513_vm14 = vmor %vm1511_vm13, %vm1512_vm12  ;;  %vm1960_vm13 = vcmask 123904  }
0x1028   :  { %v1508_v52 = vsub.f32 1.0, %v1507_v63 }
0x102a   :  { %v1509_v54 = vmul.f32 %v2165_v50, %v1508_v52 }
0x102c   :  { %v1510_v60 = vadd.f32 %v2165_v50, %v1509_v54 }
0x102e   :  { %v1514_v3 = vsel %vm1513_vm14, %v2165_v50, %v1510_v60 }
0x102f   :  { %v1519_v6 = vsel %vm1516_vm15, %v1518_v4, %v1514_v3 }
0x1030   :  { %v1522_v12 = vmul.f32 %v1519_v6, %v2807_v7 }
0x1048   :  { %v1391_v26 = vpop.permute.xlu1 %1390 }
0x1049   :  { %v2841_v27 = vmul.f32 %v1391_v26, %v1374_v20 }
0x104b   :  { %1395 = vst [vmem:[#allocation1] ss:$4 sm:$0xff] %v2841_v27 }
0x1052   :  { %v1396_v41 = vld.sshfl [vmem:[#allocation1] sm:$0xff pattern:$0x73625140] }
0x1053   :  { %1397 = vrot.lane.b32.xlu2 %v1396_v41, %s2217_s29  ;;  %1421 = vst [vmem:[#allocation1] ss:$4 sm:$0xff] %v2841_v27 }
0x105a   :  { %v1422_v42 = vld.sshfl [vmem:[#allocation1] sm:$0xff pattern:$0x73625140] }
0x105b   :  { %1524 = vrot.lane.b32.xlu2 %v2161_v9, %s2216_s2  ;;  %1423 = vrot.lane.b32.xlu1 %v1422_v42, %s2217_s29  ;;  %1539 = vst [vmem:[#allocation1] ss:$4 sm:$0xff] %v2841_v27 }
0x1062   :  { %v1540_v43 = vld.sshfl [vmem:[#allocation1] sm:$0xff pattern:$0x73625140] }
0x1063   :  { %1541 = vrot.lane.b32.xlu0 %v1540_v43, %s2217_s29 }
0x10ad   :  { %v1398_v45 = vpop.permute.xlu2 %1397 }
0x10ae   :  { %2023 = vmatmul.msk.f32.vlgmr.msra.gmra.mxu3 %vm249_vm6, %v1398_v45 }
0x10af   :  { %1702 = vmatpush.msra.mxu3 %v2212_v48 }
0x10b1   :  { %1703 = vmatpush.msra.mxu3 %v2213_v5 }
0x10b3   :  { %1704 = vmatpush.msra.mxu3 %v2214_v57 }
0x10b5   :  { %v1525_v29 = vpop.permute.xlu2 %1524  ;;  %1705 = vmatpush.msra.mxu3 %v2215_v56 }
0x10b6   :  { %v1527_v59 = vmul.f32 %v1525_v29, %v1519_v6 }
0x10b8   :  { %1529 = vrot.lane.b32.xlu0 %v1527_v59, %s2216_s2 }
0x10cd   :  { %v1424_v8 = vpop.permute.xlu1 %1423 }
0x10ce   :  { %2024 = vmatmul.msk.f32.vlgmr.msra.gmra.mxu0 %vm249_vm6, %v1424_v8 }
0x10cf   :  { %2037 = vmatpush.msk.msra.mxu0 %vm93_vm0, %v2792_v30  ;;  %v182_v30 = vld [vmem:[%s3012_s1 + $0xc] sm:$0x3] }
0x10d5   :  { %v1542_v32 = vpop.permute.xlu0 %1541 }
0x10d6   :  { %2029 = vmatmul.msk.f32.vlgmr.msrb.gmra.mxu3 %vm249_vm6, %v1542_v32 }
0x112a   :  { %v1530_v10 = vpop.permute.xlu0 %1529 }
0x112b   :  { %v2876_v13 = vadd.f32 %v1530_v10, %v1522_v12 }
0x112d   :  { %2166 = vtanh.f32 %v2876_v13 }
0x1131   :  { %v1418_v18 = vpop.f32.mrf.mxu3 }
0x1132   :  { %v1419_v36 = vadd.f32 %v2825_v62, %v1418_v18 }
0x1133   :  { %v2167_v14 = vpop.eup %2166 }
0x1134   :  { %1535 = vrot.lane.b32.xlu1 %v2167_v14, %s2216_s2 }
0x114b   :  { %v1444_v15 = vpop.f32.mrf.mxu0 }
0x114c   :  { %v1445_v1 = vadd.f32 %v2815_v51, %v1444_v15 }
0x114e   :  { %v1447_v16 = vmul.f32 0.5, %v1445_v1 }
0x1150   :  { %v1448_v20 = vmul.f32 1.442695, %v1447_v16 }
0x1152   :  { %2168 = vpow2.f32 %v1448_v20 }
0x1158   :  { %v2169_v7 = vpop.eup %2168 }
0x1159   :  { %v1450_v37 = vmul.f32 %v2169_v7, %v182_v30  ;;  %v1562_v24 = vpop.f32.mrf.mxu3 }
0x115a   :  { %v1565_v25 = vadd.f32 %v1562_v24, %v157_v35 }
0x115b   :  { %v1451_v26 = vadd.f32 %v1450_v37, %v1419_v36 }
0x115c   :  { %2170 = vtanh.f32 %v1565_v25  ;;  %v2030_v33 = vmul.f32 -1.442695, %v1565_v25 }
0x115d   :  { %2034 = vmatmul.msk.f32.vlgmr.msra.gmra.mxu2 %vm88_vm1, %v1451_v26 }
0x115e   :  { %2172 = vpow2.f32 %v2030_v33 }
0x1162   :  { %v2171_v28 = vpop.eup %2170 }
0x1163   :  { %1588 = vrot.lane.b32.xlu0 %v2171_v28, %s2216_s2 }
0x1164   :  { %v2173_v34 = vpop.eup %2172 }
0x1165   :  { %v1569_v41 = vadd.f32 1.0, %v2173_v34 }
0x1167   :  { %2174 = vrcp.f32 %v1569_v41  ;;  %v1581_v49 = vand.u32 2147483648, %v1569_v41  ;;  %vm1575_vm2 = vweird.f32 %v1569_v41  ;;  %v1579_v50 = vand.u32 2147483647, %v1569_v41 }
0x1169   :  { %v1582_v52 = vor.u32 1.1754944e-38, %v1581_v49  ;;  %vm1580_vm4 = vcmp.eq.f32.partialorder %v1579_v50, 8.507059e+37 }
0x116d   :  { %v2175_v9 = vpop.eup %2174 }
0x116e   :  { %v1571_v42 = vmul.f32 %v2175_v9, %v1569_v41  ;;  %vm1576_vm0 = vweird.f32 %v2175_v9  ;;  %v183_v41 = vld [vmem:[%s3012_s1 + $0xe] sm:$0x3] }
0x116f   :  { %vm1577_vm3 = vmor %vm1575_vm2, %vm1576_vm0 }
0x1170   :  { %v1572_v43 = vsub.f32 1.0, %v1571_v42 }
0x1172   :  { %v1573_v44 = vmul.f32 %v2175_v9, %v1572_v43 }
0x1174   :  { %v1574_v53 = vadd.f32 %v2175_v9, %v1573_v44 }
0x1176   :  { %v1578_v63 = vsel %vm1577_vm3, %v2175_v9, %v1574_v53 }
0x1177   :  { %v1583_v54 = vsel %vm1580_vm4, %v1582_v52, %v1578_v63  ;;  %v170_v63 = vrot.slane %v2461_v58, 4 }
0x1178   :  { %v1586_v48 = vmul.f32 %v1583_v54, %v2837_v39 }
0x11a6   :  { %v1536_v55 = vpop.permute.xlu1 %1535 }
0x11a7   :  { %v1538_v31 = vmul.f32 %v1536_v55, %v1519_v6  ;;  %v169_v6 = vrot.slane %v2461_v58, 2  ;;  %v1841_v58 = vld [vmem:[%s3015_s13 + $0x10] sm:$0xff] }
0x11a9   :  { %1854 = vst [vmem:[#allocation1 + $0x21] ss:$4 sm:$0xff] %v1538_v31  ;;  %1686 = vrot.lane.b32.xlu2 %v1538_v31, %s2217_s29 }
0x11d5   :  { %v1589_v45 = vpop.permute.xlu0 %1588 }
0x11d6   :  { %v1591_v60 = vmul.f32 %v1589_v45, %v1583_v54 }
0x11d8   :  { %1593 = vrot.lane.b32.xlu1 %v1591_v60, %s2216_s2 }
0x11e0   :  { %v1681_v4 = vpop.f32.mrf.mxu2 }
0x11e1   :  { %v1682_v57 = vadd.f32 %v2846_v19, %v1681_v4 }
0x11e3   :  { %v1684_v29 = vadd.f32 %v1682_v57, %v169_v6 }
0x1203   :  { %v1687_v46 = vpop.permute.xlu2 %1686 }
0x1204   :  { %2035 = vmatmul.msk.f32.vlgmr.msra.gmra.mxu3 %vm249_vm6, %v1687_v46 }
0x124a   :  { %v1594_v2 = vpop.permute.xlu1 %1593 }
0x124b   :  { %v1596_v5 = vadd.f32 %v1594_v2, %v1586_v48  ;;  %v1842_v2 = vld [vmem:[%s3015_s13 + $0x18] sm:$0xff] }
0x124c   :  { %1881 = vmatpush.msrb.mxu2 %v1842_v2 }
0x124d   :  { %2176 = vtanh.f32 %v1596_v5  ;;  %v1839_v5 = vld [vmem:[%s3015_s13] sm:$0xff] }
0x124e   :  { %1882 = vmatpush.msrb.mxu2 %v1841_v58 }
0x1253   :  { %v2177_v3 = vpop.eup %2176 }
0x1254   :  { %1599 = vrot.lane.b32.xlu2 %v2177_v3, %s2216_s2 }
0x1287   :  { %v1707_v56 = vpop.f32.mrf.mxu3 }
0x1288   :  { %v1710_v59 = vadd.f32 %v1707_v56, %v1684_v29 }
0x128a   :  { %2178 = vtanh.f32 %v1710_v59  ;;  %v2036_v10 = vmul.f32 -1.442695, %v1710_v59 }
0x128c   :  { %2180 = vpow2.f32 %v2036_v10 }
0x1290   :  { %v2179_v8 = vpop.eup %2178 }
0x1291   :  { %1733 = vrot.lane.b32.xlu2 %v2179_v8, %s2216_s2 }
0x1292   :  { %v2181_v15 = vpop.eup %2180 }
0x1293   :  { %v1714_v1 = vadd.f32 1.0, %v2181_v15 }
0x1295   :  { %2182 = vrcp.f32 %v1714_v1  ;;  %vm1720_vm7 = vweird.f32 %v1714_v1 }
0x12ae   :  { %v1600_v32 = vpop.permute.xlu2 %1599 }
0x12af   :  { %v2896_v39 = vmul.f32 %v1600_v32, %v1583_v54 }
0x12b1   :  { %1604 = vst [vmem:[#allocation1] ss:$4 sm:$0xff] %v2896_v39 }
0x12b8   :  { %v1605_v12 = vld.sshfl [vmem:[#allocation1] sm:$0xff pattern:$0x73625140] }
0x12b9   :  { %1606 = vrot.lane.b32.xlu1 %v1605_v12, %s2217_s29  ;;  %1630 = vst [vmem:[#allocation1] ss:$4 sm:$0xff] %v2896_v39 }
0x12c0   :  { %v1631_v14 = vld.sshfl [vmem:[#allocation1] sm:$0xff pattern:$0x73625140] }
0x12c1   :  { %1632 = vrot.lane.b32.xlu0 %v1631_v14, %s2217_s29  ;;  %1844 = vst [vmem:[#allocation1] ss:$4 sm:$0xff] %v2537_v11  ;;  %v2183_v11 = vpop.eup %2182 }
0x12c2   :  { %1846 = vst [vmem:[#allocation1 + $0x1] ss:$4 sm:$0xff] %v2619_v61  ;;  %v1716_v20 = vmul.f32 %v2183_v11, %v1714_v1  ;;  %vm1721_vm5 = vweird.f32 %v2183_v11 }
0x12c3   :  { %1848 = vst [vmem:[#allocation1 + $0x2] ss:$4 sm:$0xff] %v2680_v0  ;;  %v1726_v0 = vand.u32 2147483648, %v1714_v1  ;;  %vm1722_vm8 = vmor %vm1720_vm7, %vm1721_vm5 }
0x12c4   :  { %1850 = vst [vmem:[#allocation1 + $0x3] ss:$4 sm:$0xff] %v2745_v17  ;;  %v1717_v18 = vsub.f32 1.0, %v1716_v20  ;;  %v1724_v17 = vand.u32 2147483647, %v1714_v1  ;;  %v1836_v20 = vld [vmem:[%s3016_s12 + $0x8] sm:$0xff] }
0x12c5   :  { %v1727_v35 = vor.u32 1.1754944e-38, %v1726_v0 }
0x12c6   :  { %v1718_v61 = vmul.f32 %v2183_v11, %v1717_v18  ;;  %vm1725_vm9 = vcmp.eq.f32.partialorder %v1724_v17, 8.507059e+37  ;;  %v1835_v18 = vld [vmem:[%s3016_s12] sm:$0xff] }
0x12c8   :  { %v1719_v30 = vadd.f32 %v2183_v11, %v1718_v61 }
0x12ca   :  { %v1723_v7 = vsel %vm1722_vm8, %v2183_v11, %v1719_v30  ;;  %v1837_v11 = vld [vmem:[%s3016_s12 + $0x10] sm:$0xff] }
0x12cb   :  { %v1859_v16 = vld.sshfl [vmem:[#allocation1] sm:$0xff pattern:$0x73625140] }
0x12cc   :  { %1892 = vst [vmem:[#allocation1] ss:$4 sm:$0xff] %v2367_v40  ;;  %v1728_v40 = vsel %vm1725_vm9, %v1727_v35, %v1723_v7 }
0x12cd   :  { %1894 = vst [vmem:[#allocation1 + $0x1] ss:$4 sm:$0xff] %v2493_v38  ;;  %v1731_v37 = vmul.f32 %v1728_v40, %v2876_v13 }
0x12ce   :  { %1896 = vst [vmem:[#allocation1 + $0x2] ss:$4 sm:$0xff] %v2577_v21 }
0x12cf   :  { %1898 = vst [vmem:[#allocation1 + $0x3] ss:$4 sm:$0xff] %v2634_v22 }
0x12d6   :  { %v1907_v1 = vld.sshfl [vmem:[#allocation1] sm:$0xff pattern:$0x73625140] }
0x12eb   :  { %v1734_v38 = vpop.permute.xlu2 %1733 }
0x12ec   :  { %v1736_v36 = vmul.f32 %v1734_v38, %v1728_v40 }
0x12ee   :  { %1738 = vrot.lane.b32.xlu0 %v1736_v36, %s2216_s2 }
0x132b   :  { %v1607_v21 = vpop.permute.xlu1 %1606 }
0x132c   :  { %2031 = vmatmul.msk.f32.vlgmr.msrb.gmra.mxu0 %vm249_vm6, %v1607_v21  ;;  %v2051_v21 = vld [vmem:[%s3017_s14] ss:$0 sm:$0xff] }
0x1333   :  { %v1633_v22 = vpop.permute.xlu0 %1632 }
0x1334   :  { %2032 = vmatmul.msk.f32.vlgmr.msrb.gmra.mxu1 %vm249_vm6, %v1633_v22 }
0x1360   :  { %v1739_v24 = vpop.permute.xlu0 %1738 }
0x1361   :  { %v2914_v25 = vadd.f32 %v1739_v24, %v1731_v37 }
0x1363   :  { %2184 = vtanh.f32 %v2914_v25 }
0x1369   :  { %v2185_v26 = vpop.eup %2184 }
0x136a   :  { %1744 = vrot.lane.b32.xlu1 %v2185_v26, %s2216_s2 }
0x13a9   :  { %v1627_v34 = vpop.f32.mrf.mxu0 }
0x13aa   :  { %v1628_v9 = vadd.f32 %v2825_v62, %v1627_v34 }
0x13b1   :  { %v1653_v28 = vpop.f32.mrf.mxu1 }
0x13b2   :  { %v1654_v55 = vadd.f32 %v2815_v51, %v1653_v28 }
0x13b4   :  { %v1656_v31 = vmul.f32 0.5, %v1654_v55 }
0x13b6   :  { %v1657_v33 = vmul.f32 1.442695, %v1656_v31 }
0x13b8   :  { %2186 = vpow2.f32 %v1657_v33 }
0x13be   :  { %v2187_v13 = vpop.eup %2186 }
0x13bf   :  { %v1659_v42 = vmul.f32 %v2187_v13, %v183_v41 }
0x13c1   :  { %v1660_v43 = vadd.f32 %v1659_v42, %v1628_v9 }
0x13c3   :  { %2038 = vmatmul.msk.f32.vlgmr.msra.gmra.mxu0 %vm88_vm1, %v1660_v43 }
0x13dc   :  { %v1745_v44 = vpop.permute.xlu1 %1744 }
0x13dd   :  { %v1747_v53 = vmul.f32 %v1745_v44, %v1728_v40 }
0x13df   :  { %1856 = vst [vmem:[#allocation1 + $0x22] ss:$4 sm:$0xff] %v1747_v53  ;;  %1773 = vrot.lane.b32.xlu2 %v1747_v53, %s2217_s29 }
0x1439   :  { %v1774_v51 = vpop.permute.xlu2 %1773 }
0x143a   :  { %2039 = vmatmul.msk.f32.vlgmr.msra.gmra.mxu1 %vm249_vm6, %v1774_v51 }
0x1440   :  { %v1768_v49 = vpop.f32.mrf.mxu0 }
0x1441   :  { %v1769_v50 = vadd.f32 %v2846_v19, %v1768_v49  ;;  %v1840_v19 = vld [vmem:[%s3015_s13 + $0x8] sm:$0xff] }
0x1442   :  { %1883 = vmatpush.msrb.mxu2 %v1840_v19 }
0x1443   :  { %v1771_v52 = vadd.f32 %v1769_v50, %v170_v63 }
0x1444   :  { %1884 = vmatpush.msrb.mxu2 %v1839_v5 }
0x14b7   :  { %v1794_v54 = vpop.f32.mrf.mxu1 }
0x14b8   :  { %v1797_v62 = vadd.f32 %v1794_v54, %v1771_v52 }
0x14ba   :  { %2188 = vtanh.f32 %v1797_v62  ;;  %v2040_v60 = vmul.f32 -1.442695, %v1797_v62 }
0x14bc   :  { %2190 = vpow2.f32 %v2040_v60 }
0x14c0   :  { %v2189_v45 = vpop.eup %2188 }
0x14c1   :  { %1820 = vrot.lane.b32.xlu0 %v2189_v45, %s2216_s2 }
0x14c2   :  { %v2191_v46 = vpop.eup %2190 }
0x14c3   :  { %v1801_v48 = vadd.f32 1.0, %v2191_v46 }
0x14c5   :  { %2192 = vrcp.f32 %v1801_v48  ;;  %v1813_v56 = vand.u32 2147483648, %v1801_v48  ;;  %vm1807_vm10 = vweird.f32 %v1801_v48  ;;  %v1811_v59 = vand.u32 2147483647, %v1801_v48 }
0x14c7   :  { %v1814_v32 = vor.u32 1.1754944e-38, %v1813_v56  ;;  %vm1812_vm12 = vcmp.eq.f32.partialorder %v1811_v59, 8.507059e+37 }
0x14c9   :  { %1861 = vrot.lane.b32.xlu0 %v1859_v16, %s2217_s29  ;;  %v1838_v16 = vld [vmem:[%s3016_s12 + $0x18] sm:$0xff] }
0x14ca   :  { %1929 = vmatpush.msrb.mxu3 %v1838_v16 }
0x14cb   :  { %v2193_v3 = vpop.eup %2192 }
0x14cc   :  { %v1803_v4 = vmul.f32 %v2193_v3, %v1801_v48  ;;  %vm1808_vm1 = vweird.f32 %v2193_v3  ;;  %1930 = vmatpush.msrb.mxu3 %v1837_v11 }
0x14cd   :  { %vm1809_vm11 = vmor %vm1807_vm10, %vm1808_vm1 }
0x14ce   :  { %v1804_v57 = vsub.f32 1.0, %v1803_v4  ;;  %1931 = vmatpush.msrb.mxu3 %v1836_v20 }
0x14d0   :  { %v1805_v6 = vmul.f32 %v2193_v3, %v1804_v57  ;;  %1932 = vmatpush.msrb.mxu3 %v1835_v18 }
0x14d2   :  { %v1806_v29 = vadd.f32 %v2193_v3, %v1805_v6 }
0x14d4   :  { %v1810_v8 = vsel %vm1809_vm11, %v2193_v3, %v1806_v29 }
0x14d5   :  { %v1815_v10 = vsel %vm1812_vm12, %v1814_v32, %v1810_v8 }
0x14d6   :  { %v1818_v61 = vmul.f32 %v1815_v10, %v2914_v25 }
0x1533   :  { %v1821_v12 = vpop.permute.xlu0 %1820 }
0x1534   :  { %v1823_v14 = vmul.f32 %v1821_v12, %v1815_v10 }
0x1536   :  { %1825 = vrot.lane.b32.xlu1 %v1823_v14, %s2216_s2 }
0x153b   :  { %v1862_v15 = vpop.permute.xlu0 %1861 }
0x153c   :  { %2041 = vmatmul.msk.f32.vlgmr.msrb.gmra.mxu2 %vm249_vm6, %v1862_v15 }
0x153e   :  { %1909 = vrot.lane.b32.xlu1 %v1907_v1, %s2217_s29 }
0x15a8   :  { %v1826_v30 = vpop.permute.xlu1 %1825 }
0x15a9   :  { %v1828_v0 = vadd.f32 %v1826_v30, %v1818_v61 }
0x15ab   :  { %2194 = vtanh.f32 %v1828_v0 }
0x15b0   :  { %v1910_v17 = vpop.permute.xlu1 %1909 }
0x15b1   :  { %v2195_v7 = vpop.eup %2194  ;;  %2043 = vmatmul.msk.f32.vlgmr.msrb.gmra.mxu3 %vm249_vm6, %v1910_v17 }
0x15b2   :  { %1831 = vrot.lane.b32.xlu2 %v2195_v7, %s2216_s2 }
0x15bf   :  { %v1886_v22 = vpop.f32.mrf.mxu2 }
0x160c   :  { %v1832_v35 = vpop.permute.xlu2 %1831 }
0x160d   :  { %v1834_v40 = vmul.f32 %v1832_v35, %v1815_v10 }
0x160f   :  { %1858 = vst [vmem:[#allocation1 + $0x23] ss:$4 sm:$0xff] %v1834_v40 }
0x1616   :  { %v1860_v38 = vld.sshfl [vmem:[#allocation1 + $0x20] sm:$0xff pattern:$0x73625140] }
0x1617   :  { %1863 = vrot.lane.b32.xlu2 %v1860_v38, %s2217_s29  ;;  %1900 = vst [vmem:[#allocation1 + $0x20] ss:$4 sm:$0xff] %v2695_v23 }
0x1618   :  { %1902 = vst [vmem:[#allocation1 + $0x21] ss:$4 sm:$0xff] %v2768_v47 }
0x1619   :  { %1904 = vst [vmem:[#allocation1 + $0x22] ss:$4 sm:$0xff] %v2841_v27 }
0x161a   :  { %1906 = vst [vmem:[#allocation1 + $0x23] ss:$4 sm:$0xff] %v2896_v39 }
0x1621   :  { %v1908_v36 = vld.sshfl [vmem:[#allocation1 + $0x20] sm:$0xff pattern:$0x73625140] }
0x1622   :  { %1911 = vrot.lane.b32.xlu0 %v1908_v36, %s2217_s29 }
0x1634   :  { %v1934_v37 = vpop.f32.mrf.mxu3 }
0x1635   :  { %v1935_v24 = vadd.f32 %v1934_v37, %v1886_v22 }
0x1637   :  { %v1944_v25 = vadd.f32 %v2051_v21, %v1935_v24 }
0x1639   :  { %v1948_v26 = vrot.slane %v1944_v25, 2  ;;  %v1949_v23 = vrot.slane %v1944_v25, 4  ;;  %v1950_v28 = vrot.slane %v1944_v25, 6  ;;  %1961 = vst.msk [vmem:[%s3018_s15] sm:$0x3] %vm1960_vm13, %v1944_v25 }
0x163b   :  { %1962 = vst.msk [vmem:[%s3018_s15 + $0x2] sm:$0x3] %vm1960_vm13, %v1948_v26 }
0x163c   :  { %1963 = vst.msk [vmem:[%s3018_s15 + $0x4] sm:$0x3] %vm1960_vm13, %v1949_v23 }
0x163d   :  { %1964 = vst.msk [vmem:[%s3018_s15 + $0x6] sm:$0x3] %vm1960_vm13, %v1950_v28 }
0x1671   :  { %v1864_v47 = vpop.permute.xlu2 %1863 }
0x1672   :  { %2042 = vmatmul.msk.f32.gmra.mxu2 %vm249_vm6, %v1864_v47 }
0x1694   :  { %v1912_v27 = vpop.permute.xlu0 %1911 }
0x1695   :  { %2044 = vmatmul.msk.f32.gmra.mxu3 %vm249_vm6, %v1912_v27 }
0x16f5   :  { %v1889_v39 = vpop.f32.mrf.mxu2 }
0x1718   :  { %v1937_v55 = vpop.f32.mrf.mxu3 }
0x1719   :  { %v1938_v31 = vadd.f32 %v1937_v55, %v1889_v39 }
0x171b   :  { %v1945_v33 = vadd.f32 %v2051_v21, %v1938_v31 }
0x171d   :  { %v1951_v34 = vrot.slane %v1945_v33, 2  ;;  %v1952_v41 = vrot.slane %v1945_v33, 4  ;;  %v1953_v13 = vrot.slane %v1945_v33, 6  ;;  %1965 = vst.msk [vmem:[%s3018_s15 + $0x8] sm:$0x3] %vm1960_vm13, %v1945_v33 }
0x171f   :  { %1966 = vst.msk [vmem:[%s3018_s15 + $0xa] sm:$0x3] %vm1960_vm13, %v1951_v34 }
0x1720   :  { %1967 = vst.msk [vmem:[%s3018_s15 + $0xc] sm:$0x3] %vm1960_vm13, %v1952_v41 }
0x1721   :  { %1968 = vst.msk [vmem:[%s3018_s15 + $0xe] sm:$0x3] %vm1960_vm13, %v1953_v13 }

</bundles_post_ra>
